<compile_context>
chip_gen: v5e
topology: v5e:2x2
jax: 0.10.0
libtpu: 0.0.40
codegen_flags: <defaults>
</compile_context>

<pallas_src>
import functools

import jax
import jax.numpy as jnp
from jax.experimental import pallas as pl
from jax.experimental.pallas import tpu as pltpu


def _round_up(x, m):
    return ((x + m - 1) // m) * m


# ----------------------------------------------------------------------------
# Tiled linear:  y = act(x @ w + b)
# ----------------------------------------------------------------------------

def _linear_kernel(x_ref, w_ref, b_ref, o_ref, acc_ref, *, activation):
    @pl.when(pl.program_id(2) == 0)
    def _():
        acc_ref[...] = jnp.zeros_like(acc_ref)

    acc_ref[...] += jnp.dot(x_ref[...], w_ref[...],
                            preferred_element_type=jnp.float32)

    @pl.when(pl.program_id(2) == pl.num_programs(2) - 1)
    def _():
        y = acc_ref[...] + b_ref[...]
        if activation == "relu":
            y = jnp.maximum(y, 0.0)
        o_ref[...] = y.astype(o_ref.dtype)


def linear(x, w, b, activation=None, out_dtype=jnp.float32):
    M, K = x.shape
    N = w.shape[1]

    tm = min(256, _round_up(M, 8))
    Np = _round_up(N, 128)          # lane-dense output slab
    tn = min(256, Np)
    tk = K if K <= 512 else 512

    Mp = _round_up(M, tm)
    Kp = _round_up(K, tk)

    xp = x.astype(jnp.bfloat16)
    if (Mp, Kp) != (M, K):
        xp = jnp.pad(xp, ((0, Mp - M), (0, Kp - K)))
    wp = w.astype(jnp.bfloat16)
    if (Kp, Np) != (K, N):
        wp = jnp.pad(wp, ((0, Kp - K), (0, Np - N)))
    bp = b.reshape(1, N).astype(jnp.float32)
    if Np != N:
        bp = jnp.pad(bp, ((0, 0), (0, Np - N)))

    grid = (Mp // tm, Np // tn, Kp // tk)
    out = pl.pallas_call(
        functools.partial(_linear_kernel, activation=activation),
        out_shape=jax.ShapeDtypeStruct((Mp, Np), out_dtype),
        grid=grid,
        in_specs=[
            pl.BlockSpec((tm, tk), lambda i, j, k: (i, k)),
            pl.BlockSpec((tk, tn), lambda i, j, k: (k, j)),
            pl.BlockSpec((1, tn), lambda i, j, k: (0, j)),
        ],
        out_specs=pl.BlockSpec((tm, tn), lambda i, j, k: (i, j)),
        scratch_shapes=[pltpu.VMEM((tm, tn), jnp.float32)],
        compiler_params=pltpu.CompilerParams(
            dimension_semantics=("parallel", "parallel", "arbitrary"),
            vmem_limit_bytes=32 * 1024 * 1024),
    )(xp, wp, bp)

    if (Mp, Np) != (M, N):
        out = out[:M, :N]
    return out


# ----------------------------------------------------------------------------
# Fused residual-add + LayerNorm
# ----------------------------------------------------------------------------

def _add_ln_kernel(x_ref, a_ref, g_ref, b_ref, o_ref):
    x = x_ref[...] + a_ref[...]
    mu = jnp.mean(x, axis=-1, keepdims=True)
    xc = x - mu
    var = jnp.mean(xc * xc, axis=-1, keepdims=True)
    o_ref[...] = xc * jax.lax.rsqrt(var + 1e-5) * g_ref[...] + b_ref[...]


def add_layernorm(x, a, g, b):
    M, D = x.shape
    tm = min(512, _round_up(M, 8))
    Mp = _round_up(M, tm)
    if Mp != M:
        x = jnp.pad(x, ((0, Mp - M), (0, 0)))
        a = jnp.pad(a, ((0, Mp - M), (0, 0)))
    out = pl.pallas_call(
        _add_ln_kernel,
        out_shape=jax.ShapeDtypeStruct((Mp, D), jnp.float32),
        grid=(Mp // tm,),
        in_specs=[
            pl.BlockSpec((tm, D), lambda i: (i, 0)),
            pl.BlockSpec((tm, D), lambda i: (i, 0)),
            pl.BlockSpec((1, D), lambda i: (0, 0)),
            pl.BlockSpec((1, D), lambda i: (0, 0)),
        ],
        out_specs=pl.BlockSpec((tm, D), lambda i: (i, 0)),
        compiler_params=pltpu.CompilerParams(
            dimension_semantics=("parallel",)),
    )(x, a, g.reshape(1, D), b.reshape(1, D))
    return out[:M]


# ----------------------------------------------------------------------------
# Fused feed-forward:  relu(x @ w1 + b1) @ w2 + b2
# ----------------------------------------------------------------------------

def _ffn_kernel(x_ref, w1_ref, b1_ref, w2_ref, b2_ref, o_ref):
    h = jnp.dot(x_ref[...], w1_ref[...],
                preferred_element_type=jnp.float32) + b1_ref[...]
    h = jnp.maximum(h, 0.0).astype(jnp.bfloat16)
    o_ref[...] = jnp.dot(h, w2_ref[...],
                         preferred_element_type=jnp.float32) + b2_ref[...]


def feed_forward(x, p):
    B, S, D = x.shape
    Dff = p["w1"].shape[1]
    M = B * S
    xf = x.reshape(M, D).astype(jnp.bfloat16)
    tm = min(256, _round_up(M, 8))
    Mp = _round_up(M, tm)
    if Mp != M:
        xf = jnp.pad(xf, ((0, Mp - M), (0, 0)))
    out = pl.pallas_call(
        _ffn_kernel,
        out_shape=jax.ShapeDtypeStruct((Mp, D), jnp.float32),
        grid=(Mp // tm,),
        in_specs=[
            pl.BlockSpec((tm, D), lambda i: (i, 0)),
            pl.BlockSpec((D, Dff), lambda i: (0, 0)),
            pl.BlockSpec((1, Dff), lambda i: (0, 0)),
            pl.BlockSpec((Dff, D), lambda i: (0, 0)),
            pl.BlockSpec((1, D), lambda i: (0, 0)),
        ],
        out_specs=pl.BlockSpec((tm, D), lambda i: (i, 0)),
        compiler_params=pltpu.CompilerParams(
            dimension_semantics=("parallel",),
            vmem_limit_bytes=32 * 1024 * 1024),
    )(xf,
      p["w1"].astype(jnp.bfloat16), p["b1"].reshape(1, Dff),
      p["w2"].astype(jnp.bfloat16), p["b2"].reshape(1, D))
    return out[:M].reshape(B, S, D)


# ----------------------------------------------------------------------------
# Attention: one grid step per batch, all heads at once; mask built in-kernel
# ----------------------------------------------------------------------------

def _attn_kernel(q_ref, k_ref, v_ref, kb_ref, o_ref, *, scale, causal):
    q = q_ref[0]                         # (H, Sq, Dh) bf16
    k = k_ref[0]                         # (H, Sk, Dh) bf16
    v = v_ref[0]                         # (H, Sk, Dh) bf16

    # scores: (H, Sq, Sk), f32 accumulation, no explicit k transpose
    s = jax.lax.dot_general(q, k, (((2,), (2,)), ((0,), (0,))),
                            preferred_element_type=jnp.float32) * scale
    s = s + kb_ref[...]                  # (1, 1, Sk) additive pad bias

    if causal:
        _, Sq, Sk = s.shape
        rows = jax.lax.broadcasted_iota(jnp.int32, (Sq, Sk), 0)
        cols = jax.lax.broadcasted_iota(jnp.int32, (Sq, Sk), 1)
        s = jnp.where((cols <= rows)[None, :, :], s, -1e9)

    m = jnp.max(s, axis=-1, keepdims=True)
    p = jnp.exp(s - m)
    l = jnp.sum(p, axis=-1, keepdims=True)
    p = p * pl.reciprocal(l, approx=True)

    o_ref[0] = jax.lax.dot_general(p.astype(jnp.bfloat16), v,
                                   (((2,), (1,)), ((0,), (0,))),
                                   preferred_element_type=jnp.float32)


def attention(q, k, v, key_bias, causal):
    # q: (B, H, Sq, Dh), k/v: (B, H, Sk, Dh), key_bias: (B, 1, Sk) additive
    B, H, Sq, Dh = q.shape
    Sk = k.shape[2]
    q = q.astype(jnp.bfloat16)
    k = k.astype(jnp.bfloat16)
    v = v.astype(jnp.bfloat16)
    return pl.pallas_call(
        functools.partial(_attn_kernel, scale=1.0 / (Dh ** 0.5), causal=causal),
        out_shape=jax.ShapeDtypeStruct((B, H, Sq, Dh), jnp.float32),
        grid=(B,),
        in_specs=[
            pl.BlockSpec((1, H, Sq, Dh), lambda b: (b, 0, 0, 0)),
            pl.BlockSpec((1, H, Sk, Dh), lambda b: (b, 0, 0, 0)),
            pl.BlockSpec((1, H, Sk, Dh), lambda b: (b, 0, 0, 0)),
            pl.BlockSpec((1, 1, Sk), lambda b: (b, 0, 0)),
        ],
        out_specs=pl.BlockSpec((1, H, Sq, Dh), lambda b: (b, 0, 0, 0)),
        compiler_params=pltpu.CompilerParams(
            dimension_semantics=("parallel",)),
    )(q, k, v, key_bias)


# ----------------------------------------------------------------------------
# Transformer blocks (glue around the kernels)
# ----------------------------------------------------------------------------

def sinusoid_pos_table(seq_len, d_model):
    pos = jnp.arange(seq_len, dtype=jnp.float32)[:, None]
    i = jnp.arange(d_model)[None, :]
    denom = jnp.power(10000.0, (2 * (i // 2)).astype(jnp.float32) / d_model)
    angle = pos / denom
    return jnp.where(i % 2 == 0, jnp.sin(angle), jnp.cos(angle)).astype(jnp.float32)


def self_attention_block(x, p, key_bias, n_heads, causal):
    B, S, D = x.shape
    dh = D // n_heads
    # fused QKV projection: one (D, 3D) matmul, bf16 output for attention
    qkv = linear(x.reshape(B * S, D), p["wqkv"], p["bqkv"],
                 out_dtype=jnp.bfloat16)
    qkv = qkv.reshape(B, S, 3, n_heads, dh).transpose(2, 0, 3, 1, 4)
    o = attention(qkv[0], qkv[1], qkv[2], key_bias, causal)     # (B, H, S, dh)
    o = o.transpose(0, 2, 1, 3).reshape(B * S, D)
    return linear(o, p["wo"], p["bo"]).reshape(B, S, D)


def cross_attention_block(y, enc, p, key_bias, n_heads):
    B, St, D = y.shape
    Ss = enc.shape[1]
    dh = D // n_heads
    q = linear(y.reshape(B * St, D), p["wq"], p["bq"],
               out_dtype=jnp.bfloat16)
    q = q.reshape(B, St, n_heads, dh).transpose(0, 2, 1, 3)
    # fused K/V projection of encoder output: one (D, 2D) matmul
    kv = linear(enc.reshape(B * Ss, D), p["wkv"], p["bkv"],
                out_dtype=jnp.bfloat16)
    kv = kv.reshape(B, Ss, 2, n_heads, dh).transpose(2, 0, 3, 1, 4)
    o = attention(q, kv[0], kv[1], key_bias, causal=False)      # (B, H, St, dh)
    o = o.transpose(0, 2, 1, 3).reshape(B * St, D)
    return linear(o, p["wo"], p["bo"]).reshape(B, St, D)


def transformer_forward(params, src, trg, *, pad_idx, n_heads):
    B, Ss = src.shape
    St = trg.shape[1]
    D = params["src_emb"].shape[1]
    NEG = -1e9

    # Thin additive key-pad biases (B, 1, Sk) — no (B, Sq, Sk) materialization.
    src_key_bias = jnp.where(src != pad_idx, 0.0, NEG).astype(jnp.float32)
    src_key_bias = src_key_bias.reshape(B, 1, Ss)
    trg_key_bias = jnp.where(trg != pad_idx, 0.0, NEG).astype(jnp.float32)
    trg_key_bias = trg_key_bias.reshape(B, 1, St)

    # Encoder
    x = jnp.take(params["src_emb"], src, axis=0) + sinusoid_pos_table(Ss, D)[None]
    for layer in params["enc_layers"]:
        a = self_attention_block(x, layer["attn"], src_key_bias, n_heads, False)
        x = add_layernorm(x.reshape(B * Ss, D), a.reshape(B * Ss, D),
                          layer["ln1_g"], layer["ln1_b"]).reshape(B, Ss, D)
        f = feed_forward(x, layer["ffn"])
        x = add_layernorm(x.reshape(B * Ss, D), f.reshape(B * Ss, D),
                          layer["ln2_g"], layer["ln2_b"]).reshape(B, Ss, D)
    enc_out = x

    # Decoder
    y = jnp.take(params["trg_emb"], trg, axis=0) + sinusoid_pos_table(St, D)[None]
    for layer in params["dec_layers"]:
        a = self_attention_block(y, layer["self_attn"], trg_key_bias, n_heads, True)
        y = add_layernorm(y.reshape(B * St, D), a.reshape(B * St, D),
                          layer["ln1_g"], layer["ln1_b"]).reshape(B, St, D)
        c = cross_attention_block(y, enc_out, layer["cross_attn"],
                                  src_key_bias, n_heads)
        y = add_layernorm(y.reshape(B * St, D), c.reshape(B * St, D),
                          layer["ln2_g"], layer["ln2_b"]).reshape(B, St, D)
        f = feed_forward(y, layer["ffn"])
        y = add_layernorm(y.reshape(B * St, D), f.reshape(B * St, D),
                          layer["ln3_g"], layer["ln3_b"]).reshape(B, St, D)

    # Vocab projection — linear() pads N to a 128-lane slab and slices back.
    logits = linear(y.reshape(B * St, D), params["proj_w"], params["proj_b"])
    return logits.reshape(B, St, -1)


# ----------------------------------------------------------------------------
# Deterministic parameter init (fused QKV / KV layout)
# ----------------------------------------------------------------------------

def _dense(key, shape, scale=0.02):
    return (scale * jax.random.normal(key, shape)).astype(jnp.float32)


def init_self_attn(key, d_model):
    k1, k2 = jax.random.split(key)
    return {
        "wqkv": _dense(k1, (d_model, 3 * d_model)),
        "bqkv": jnp.zeros((3 * d_model,), jnp.float32),
        "wo": _dense(k2, (d_model, d_model)),
        "bo": jnp.zeros((d_model,), jnp.float32),
    }


def init_cross_attn(key, d_model):
    k1, k2, k3 = jax.random.split(key, 3)
    return {
        "wq": _dense(k1, (d_model, d_model)),
        "bq": jnp.zeros((d_model,), jnp.float32),
        "wkv": _dense(k2, (d_model, 2 * d_model)),
        "bkv": jnp.zeros((2 * d_model,), jnp.float32),
        "wo": _dense(k3, (d_model, d_model)),
        "bo": jnp.zeros((d_model,), jnp.float32),
    }


def init_ffn(key, d_model, d_ff):
    k1, k2 = jax.random.split(key)
    return {
        "w1": _dense(k1, (d_model, d_ff)), "b1": jnp.zeros((d_ff,), jnp.float32),
        "w2": _dense(k2, (d_ff, d_model)), "b2": jnp.zeros((d_model,), jnp.float32),
    }


def init_params(key, vocab, d_model, d_ff, n_layers):
    keys = jax.random.split(key, 3 + 2 * n_layers)
    ones = jnp.ones((d_model,), jnp.float32)
    zeros = jnp.zeros((d_model,), jnp.float32)
    params = {
        "src_emb": _dense(keys[0], (vocab, d_model)),
        "trg_emb": _dense(keys[1], (vocab, d_model)),
        "proj_w": _dense(keys[2], (d_model, vocab)),
        "proj_b": jnp.zeros((vocab,), jnp.float32),
        "enc_layers": [],
        "dec_layers": [],
    }
    for i in range(n_layers):
        k_enc = jax.random.split(keys[3 + i], 2)
        params["enc_layers"].append({
            "attn": init_self_attn(k_enc[0], d_model),
            "ffn": init_ffn(k_enc[1], d_model, d_ff),
            "ln1_g": ones, "ln1_b": zeros,
            "ln2_g": ones, "ln2_b": zeros,
        })
        k_dec = jax.random.split(keys[3 + n_layers + i], 3)
        params["dec_layers"].append({
            "self_attn": init_self_attn(k_dec[0], d_model),
            "cross_attn": init_cross_attn(k_dec[1], d_model),
            "ffn": init_ffn(k_dec[2], d_model, d_ff),
            "ln1_g": ones, "ln1_b": zeros,
            "ln2_g": ones, "ln2_b": zeros,
            "ln3_g": ones, "ln3_b": zeros,
        })
    return params


# ----------------------------------------------------------------------------
# Main
# ----------------------------------------------------------------------------

if __name__ == "__main__":
    VOCAB = 32        # len(i2w); index 0 plays the role of '_pad'
    PAD_IDX = 0
    D_MODEL = 32
    N_HEADS = 4
    D_FF = 64
    N_LAYERS = 2
    B, S_SRC, S_TRG = 2, 8, 8

    key = jax.random.PRNGKey(0)
    k_par, k_src, k_trg = jax.random.split(key, 3)

    params = init_params(k_par, VOCAB, D_MODEL, D_FF, N_LAYERS)

    src = jax.random.randint(k_src, (B, S_SRC), 1, VOCAB, dtype=jnp.int32)
    trg = jax.random.randint(k_trg, (B, S_TRG), 1, VOCAB, dtype=jnp.int32)
    # add some padding so the masks actually do something
    src = src.at[0, -2:].set(PAD_IDX)
    trg = trg.at[1, -3:].set(PAD_IDX)

    fwd = jax.jit(functools.partial(transformer_forward,
                                    pad_idx=PAD_IDX, n_heads=N_HEADS))
    logits = fwd(params, src, trg)
    logits = jax.block_until_ready(logits)

    assert logits.shape == (B, S_TRG, VOCAB), logits.shape
    assert bool(jnp.all(jnp.isfinite(logits)))
    # TODO(synk): dropout layers are omitted (eval-mode forward semantics).
    print("KERNEL_OK")
</pallas_src>

<mosaic_0001>
module attributes {stable_mosaic.version = 11 : i64} {
  func.func @_linear_kernel(%arg0: i32, %arg1: i32, %arg2: i32, %arg3: memref<16x32xbf16, #tpu.memory_space<vmem>>, %arg4: memref<32x128xbf16, #tpu.memory_space<vmem>>, %arg5: memref<1x128xf32, #tpu.memory_space<vmem>>, %arg6: memref<16x128xbf16, #tpu.memory_space<vmem>>, %arg7: memref<16x128xf32, #tpu.memory_space<vmem>>) attributes {dimension_semantics = [#tpu.dimension_semantics<parallel>, #tpu.dimension_semantics<parallel>, #tpu.dimension_semantics<arbitrary>], iteration_bounds = array<i64: 1, 1, 1>, scalar_prefetch = 0 : i64, scratch_operands = 1 : i64, tpu.core_type = #tpu.core_type<tc>, window_params = [{transform_indices = @transform_0, window_bounds = array<i64: 16, 32>}, {transform_indices = @transform_1, window_bounds = array<i64: 32, 128>}, {transform_indices = @transform_2, window_bounds = array<i64: 1, 128>}, {transform_indices = @transform_3, window_bounds = array<i64: 16, 128>}]} {
    %c0_i32 = arith.constant 0 : i32
    %0 = arith.cmpi eq, %arg2, %c0_i32 : i32
    %1 = arith.extui %0 : i1 to i32
    %c0_i32_0 = arith.constant 0 : i32
    %2 = arith.cmpi ne, %1, %c0_i32_0 : i32
    scf.if %2 {
      %cst_10 = arith.constant 0.000000e+00 : f32
      %12 = vector.broadcast %cst_10 : f32 to vector<16x128xf32>
      %c0_11 = arith.constant 0 : index
      %c0_12 = arith.constant 0 : index
      %13 = vector.load %arg7[%c0_11, %c0_12] : memref<16x128xf32, #tpu.memory_space<vmem>>, vector<16x128xf32>
      tpu.vector_store %arg7[%c0_11, %c0_12], %12 {strides = array<i32>} : memref<16x128xf32, #tpu.memory_space<vmem>>, vector<16x128xf32>,
    } else {
    }
    %c0 = arith.constant 0 : index
    %c0_1 = arith.constant 0 : index
    %3 = vector.load %arg7[%c0, %c0_1] : memref<16x128xf32, #tpu.memory_space<vmem>>, vector<16x128xf32>
    %c0_2 = arith.constant 0 : index
    %c0_3 = arith.constant 0 : index
    %4 = vector.load %arg3[%c0_2, %c0_3] : memref<16x32xbf16, #tpu.memory_space<vmem>>, vector<16x32xbf16>
    %c0_4 = arith.constant 0 : index
    %c0_5 = arith.constant 0 : index
    %5 = vector.load %arg4[%c0_4, %c0_5] : memref<32x128xbf16, #tpu.memory_space<vmem>>, vector<32x128xbf16>
    %cst = arith.constant dense<0.000000e+00> : vector<16x128xf32>
    %6 = tpu.matmul %4, %5, %cst {dimension_numbers = #tpu.dot_dimension_numbers<[1], [0], [0], [1], [0, 0, 1, 1], [], []>} : vector<16x32xbf16>, vector<32x128xbf16>, vector<16x128xf32> -> vector<16x128xf32>
    %7 = arith.addf %3, %6 : vector<16x128xf32>
    %c0_6 = arith.constant 0 : index
    %c0_7 = arith.constant 0 : index
    %8 = vector.load %arg7[%c0_6, %c0_7] : memref<16x128xf32, #tpu.memory_space<vmem>>, vector<16x128xf32>
    tpu.vector_store %arg7[%c0_6, %c0_7], %7 {strides = array<i32>} : memref<16x128xf32, #tpu.memory_space<vmem>>, vector<16x128xf32>,
    %c0_i32_8 = arith.constant 0 : i32
    %9 = arith.cmpi eq, %arg2, %c0_i32_8 : i32
    %10 = arith.extui %9 : i1 to i32
    %c0_i32_9 = arith.constant 0 : i32
    %11 = arith.cmpi ne, %10, %c0_i32_9 : i32
    scf.if %11 {
      %c0_10 = arith.constant 0 : index
      %c0_11 = arith.constant 0 : index
      %12 = vector.load %arg7[%c0_10, %c0_11] : memref<16x128xf32, #tpu.memory_space<vmem>>, vector<16x128xf32>
      %c0_12 = arith.constant 0 : index
      %c0_13 = arith.constant 0 : index
      %13 = vector.load %arg5[%c0_12, %c0_13] : memref<1x128xf32, #tpu.memory_space<vmem>>, vector<1x128xf32>
      %14 = vector.broadcast %13 : vector<1x128xf32> to vector<16x128xf32>
      %15 = arith.addf %12, %14 : vector<16x128xf32>
      %16 = arith.truncf %15 : vector<16x128xf32> to vector<16x128xbf16>
      %c0_14 = arith.constant 0 : index
      %c0_15 = arith.constant 0 : index
      %17 = vector.load %arg6[%c0_14, %c0_15] : memref<16x128xbf16, #tpu.memory_space<vmem>>, vector<16x128xbf16>
      tpu.vector_store %arg6[%c0_14, %c0_15], %16 {strides = array<i32>} : memref<16x128xbf16, #tpu.memory_space<vmem>>, vector<16x128xbf16>,
    } else {
    }
    return
  }
  func.func @transform_0(%arg0: i32, %arg1: i32, %arg2: i32) -> (i32, i32) {
    %c0_i32 = arith.constant 0 : i32
    return %arg0, %arg2 : i32, i32
  }
  func.func @transform_1(%arg0: i32, %arg1: i32, %arg2: i32) -> (i32, i32) {
    %c0_i32 = arith.constant 0 : i32
    return %arg2, %arg1 : i32, i32
  }
  func.func @transform_2(%arg0: i32, %arg1: i32, %arg2: i32) -> (i32, i32) {
    %c0_i32 = arith.constant 0 : i32
    %c0_i32_0 = arith.constant 0 : i32
    return %c0_i32, %arg1 : i32, i32
  }
  func.func @transform_3(%arg0: i32, %arg1: i32, %arg2: i32) -> (i32, i32) {
    %c0_i32 = arith.constant 0 : i32
    return %arg0, %arg1 : i32, i32
  }
}

module attributes {stable_mosaic.version = 11 : i64} {
  func.func @_attn_kernel(%arg0: i32, %arg1: memref<1x4x8x8xbf16, #tpu.memory_space<vmem>>, %arg2: memref<1x4x8x8xbf16, #tpu.memory_space<vmem>>, %arg3: memref<1x4x8x8xbf16, #tpu.memory_space<vmem>>, %arg4: memref<1x1x8xf32, #tpu.memory_space<vmem>>, %arg5: memref<1x4x8x8xf32, #tpu.memory_space<vmem>>) attributes {dimension_semantics = [#tpu.dimension_semantics<parallel>], iteration_bounds = array<i64: 2>, scalar_prefetch = 0 : i64, scratch_operands = 0 : i64, tpu.core_type = #tpu.core_type<tc>, window_params = [{transform_indices = @transform_0, window_bounds = array<i64: 1, 4, 8, 8>}, {transform_indices = @transform_1, window_bounds = array<i64: 1, 4, 8, 8>}, {transform_indices = @transform_2, window_bounds = array<i64: 1, 4, 8, 8>}, {transform_indices = @transform_3, window_bounds = array<i64: 1, 1, 8>}, {transform_indices = @transform_4, window_bounds = array<i64: 1, 4, 8, 8>}]} {
    %c0 = arith.constant 0 : index
    %c0_0 = arith.constant 0 : index
    %c0_1 = arith.constant 0 : index
    %c0_2 = arith.constant 0 : index
    %0 = vector.load %arg1[%c0, %c0_0, %c0_1, %c0_2] : memref<1x4x8x8xbf16, #tpu.memory_space<vmem>>, vector<1x4x8x8xbf16>
    %1 = vector.shape_cast %0 : vector<1x4x8x8xbf16> to vector<4x8x8xbf16>
    %c0_3 = arith.constant 0 : index
    %c0_4 = arith.constant 0 : index
    %c0_5 = arith.constant 0 : index
    %c0_6 = arith.constant 0 : index
    %2 = vector.load %arg2[%c0_3, %c0_4, %c0_5, %c0_6] : memref<1x4x8x8xbf16, #tpu.memory_space<vmem>>, vector<1x4x8x8xbf16>
    %3 = vector.shape_cast %2 : vector<1x4x8x8xbf16> to vector<4x8x8xbf16>
    %c0_7 = arith.constant 0 : index
    %c0_8 = arith.constant 0 : index
    %c0_9 = arith.constant 0 : index
    %c0_10 = arith.constant 0 : index
    %4 = vector.load %arg3[%c0_7, %c0_8, %c0_9, %c0_10] : memref<1x4x8x8xbf16, #tpu.memory_space<vmem>>, vector<1x4x8x8xbf16>
    %5 = vector.shape_cast %4 : vector<1x4x8x8xbf16> to vector<4x8x8xbf16>
    %cst = arith.constant dense<0.000000e+00> : vector<4x8x8xf32>
    %6 = tpu.matmul %1, %3, %cst {dimension_numbers = #tpu.dot_dimension_numbers<[2], [2], [1], [1], [0, 0, 0, 1, 1, 1], [0], [0]>} : vector<4x8x8xbf16>, vector<4x8x8xbf16>, vector<4x8x8xf32> -> vector<4x8x8xf32>
    %cst_11 = arith.constant 0.353553385 : f32
    %7 = vector.broadcast %cst_11 : f32 to vector<4x8x8xf32>
    %8 = arith.mulf %6, %7 : vector<4x8x8xf32>
    %c0_12 = arith.constant 0 : index
    %c0_13 = arith.constant 0 : index
    %c0_14 = arith.constant 0 : index
    %9 = vector.load %arg4[%c0_12, %c0_13, %c0_14] : memref<1x1x8xf32, #tpu.memory_space<vmem>>, vector<1x1x8xf32>
    %10 = vector.broadcast %9 : vector<1x1x8xf32> to vector<4x8x8xf32>
    %11 = arith.addf %8, %10 : vector<4x8x8xf32>
    %12 = tpu.iota {dimensions = array<i32: 0>} : vector<8x8xi32>
    %13 = tpu.iota {dimensions = array<i32: 1>} : vector<8x8xi32>
    %14 = arith.cmpi sle, %13, %12 : vector<8x8xi32>
    %15 = vector.shape_cast %14 : vector<8x8xi1> to vector<1x8x8xi1>
    %cst_15 = arith.constant -1.000000e+09 : f32
    %16 = vector.shape_cast %15 : vector<1x8x8xi1> to vector<1x8x8xi1>
    %17 = vector.broadcast %16 : vector<1x8x8xi1> to vector<4x8x8xi1>
    %18 = vector.broadcast %cst_15 : f32 to vector<4x8x8xf32>
    %19 = arith.select %17, %11, %18 : vector<4x8x8xi1>, vector<4x8x8xf32>
    %cst_16 = arith.constant dense<0xFF800000> : vector<4x8xf32>
    %20 = vector.multi_reduction <maximumf>, %19, %cst_16 [2] : vector<4x8x8xf32> to vector<4x8xf32>
    %21 = vector.shape_cast %20 : vector<4x8xf32> to vector<4x8x1xf32>
    %22 = vector.broadcast %21 : vector<4x8x1xf32> to vector<4x8x8xf32>
    %23 = arith.subf %19, %22 : vector<4x8x8xf32>
    %24 = math.exp %23 : vector<4x8x8xf32>
    %cst_17 = arith.constant dense<0.000000e+00> : vector<4x8xf32>
    %25 = vector.multi_reduction <add>, %24, %cst_17 [2] : vector<4x8x8xf32> to vector<4x8xf32>
    %26 = vector.shape_cast %25 : vector<4x8xf32> to vector<4x8x1xf32>
    %27 = tpu.reciprocal %26 {approx = true} : vector<4x8x1xf32> -> vector<4x8x1xf32>
    %28 = vector.broadcast %27 : vector<4x8x1xf32> to vector<4x8x8xf32>
    %29 = arith.mulf %24, %28 : vector<4x8x8xf32>
    %30 = arith.truncf %29 : vector<4x8x8xf32> to vector<4x8x8xbf16>
    %cst_18 = arith.constant dense<0.000000e+00> : vector<4x8x8xf32>
    %31 = tpu.matmul %30, %5, %cst_18 {dimension_numbers = #tpu.dot_dimension_numbers<[2], [1], [1], [2], [0, 0, 0, 1, 1, 2], [0], [0]>} : vector<4x8x8xbf16>, vector<4x8x8xbf16>, vector<4x8x8xf32> -> vector<4x8x8xf32>
    %c0_19 = arith.constant 0 : index
    %c0_20 = arith.constant 0 : index
    %c0_21 = arith.constant 0 : index
    %c0_22 = arith.constant 0 : index
    %32 = vector.load %arg5[%c0_19, %c0_20, %c0_21, %c0_22] : memref<1x4x8x8xf32, #tpu.memory_space<vmem>>, vector<1x4x8x8xf32>
    %33 = vector.shape_cast %32 : vector<1x4x8x8xf32> to vector<4x8x8xf32>
    %34 = vector.shape_cast %31 : vector<4x8x8xf32> to vector<1x4x8x8xf32>
    tpu.vector_store %arg5[%c0_19, %c0_20, %c0_21, %c0_22], %34 {strides = array<i32>} : memref<1x4x8x8xf32, #tpu.memory_space<vmem>>, vector<1x4x8x8xf32>,
    return
  }
  func.func @transform_0(%arg0: i32) -> (i32, i32, i32, i32) {
    %c0_i32 = arith.constant 0 : i32
    %c0_i32_0 = arith.constant 0 : i32
    %c0_i32_1 = arith.constant 0 : i32
    %c0_i32_2 = arith.constant 0 : i32
    return %arg0, %c0_i32, %c0_i32_0, %c0_i32_1 : i32, i32, i32, i32
  }
  func.func @transform_1(%arg0: i32) -> (i32, i32, i32, i32) {
    %c0_i32 = arith.constant 0 : i32
    %c0_i32_0 = arith.constant 0 : i32
    %c0_i32_1 = arith.constant 0 : i32
    %c0_i32_2 = arith.constant 0 : i32
    return %arg0, %c0_i32, %c0_i32_0, %c0_i32_1 : i32, i32, i32, i32
  }
  func.func @transform_2(%arg0: i32) -> (i32, i32, i32, i32) {
    %c0_i32 = arith.constant 0 : i32
    %c0_i32_0 = arith.constant 0 : i32
    %c0_i32_1 = arith.constant 0 : i32
    %c0_i32_2 = arith.constant 0 : i32
    return %arg0, %c0_i32, %c0_i32_0, %c0_i32_1 : i32, i32, i32, i32
  }
  func.func @transform_3(%arg0: i32) -> (i32, i32, i32) {
    %c0_i32 = arith.constant 0 : i32
    %c0_i32_0 = arith.constant 0 : i32
    %c0_i32_1 = arith.constant 0 : i32
    return %arg0, %c0_i32, %c0_i32_0 : i32, i32, i32
  }
  func.func @transform_4(%arg0: i32) -> (i32, i32, i32, i32) {
    %c0_i32 = arith.constant 0 : i32
    %c0_i32_0 = arith.constant 0 : i32
    %c0_i32_1 = arith.constant 0 : i32
    %c0_i32_2 = arith.constant 0 : i32
    return %arg0, %c0_i32, %c0_i32_0, %c0_i32_1 : i32, i32, i32, i32
  }
}

module attributes {stable_mosaic.version = 11 : i64} {
  func.func @_linear_kernel(%arg0: i32, %arg1: i32, %arg2: i32, %arg3: memref<16x32xbf16, #tpu.memory_space<vmem>>, %arg4: memref<32x128xbf16, #tpu.memory_space<vmem>>, %arg5: memref<1x128xf32, #tpu.memory_space<vmem>>, %arg6: memref<16x128xf32, #tpu.memory_space<vmem>>, %arg7: memref<16x128xf32, #tpu.memory_space<vmem>>) attributes {dimension_semantics = [#tpu.dimension_semantics<parallel>, #tpu.dimension_semantics<parallel>, #tpu.dimension_semantics<arbitrary>], iteration_bounds = array<i64: 1, 1, 1>, scalar_prefetch = 0 : i64, scratch_operands = 1 : i64, tpu.core_type = #tpu.core_type<tc>, window_params = [{transform_indices = @transform_0, window_bounds = array<i64: 16, 32>}, {transform_indices = @transform_1, window_bounds = array<i64: 32, 128>}, {transform_indices = @transform_2, window_bounds = array<i64: 1, 128>}, {transform_indices = @transform_3, window_bounds = array<i64: 16, 128>}]} {
    %c0_i32 = arith.constant 0 : i32
    %0 = arith.cmpi eq, %arg2, %c0_i32 : i32
    %1 = arith.extui %0 : i1 to i32
    %c0_i32_0 = arith.constant 0 : i32
    %2 = arith.cmpi ne, %1, %c0_i32_0 : i32
    scf.if %2 {
      %cst_10 = arith.constant 0.000000e+00 : f32
      %12 = vector.broadcast %cst_10 : f32 to vector<16x128xf32>
      %c0_11 = arith.constant 0 : index
      %c0_12 = arith.constant 0 : index
      %13 = vector.load %arg7[%c0_11, %c0_12] : memref<16x128xf32, #tpu.memory_space<vmem>>, vector<16x128xf32>
      tpu.vector_store %arg7[%c0_11, %c0_12], %12 {strides = array<i32>} : memref<16x128xf32, #tpu.memory_space<vmem>>, vector<16x128xf32>,
    } else {
    }
    %c0 = arith.constant 0 : index
    %c0_1 = arith.constant 0 : index
    %3 = vector.load %arg7[%c0, %c0_1] : memref<16x128xf32, #tpu.memory_space<vmem>>, vector<16x128xf32>
    %c0_2 = arith.constant 0 : index
    %c0_3 = arith.constant 0 : index
    %4 = vector.load %arg3[%c0_2, %c0_3] : memref<16x32xbf16, #tpu.memory_space<vmem>>, vector<16x32xbf16>
    %c0_4 = arith.constant 0 : index
    %c0_5 = arith.constant 0 : index
    %5 = vector.load %arg4[%c0_4, %c0_5] : memref<32x128xbf16, #tpu.memory_space<vmem>>, vector<32x128xbf16>
    %cst = arith.constant dense<0.000000e+00> : vector<16x128xf32>
    %6 = tpu.matmul %4, %5, %cst {dimension_numbers = #tpu.dot_dimension_numbers<[1], [0], [0], [1], [0, 0, 1, 1], [], []>} : vector<16x32xbf16>, vector<32x128xbf16>, vector<16x128xf32> -> vector<16x128xf32>
    %7 = arith.addf %3, %6 : vector<16x128xf32>
    %c0_6 = arith.constant 0 : index
    %c0_7 = arith.constant 0 : index
    %8 = vector.load %arg7[%c0_6, %c0_7] : memref<16x128xf32, #tpu.memory_space<vmem>>, vector<16x128xf32>
    tpu.vector_store %arg7[%c0_6, %c0_7], %7 {strides = array<i32>} : memref<16x128xf32, #tpu.memory_space<vmem>>, vector<16x128xf32>,
    %c0_i32_8 = arith.constant 0 : i32
    %9 = arith.cmpi eq, %arg2, %c0_i32_8 : i32
    %10 = arith.extui %9 : i1 to i32
    %c0_i32_9 = arith.constant 0 : i32
    %11 = arith.cmpi ne, %10, %c0_i32_9 : i32
    scf.if %11 {
      %c0_10 = arith.constant 0 : index
      %c0_11 = arith.constant 0 : index
      %12 = vector.load %arg7[%c0_10, %c0_11] : memref<16x128xf32, #tpu.memory_space<vmem>>, vector<16x128xf32>
      %c0_12 = arith.constant 0 : index
      %c0_13 = arith.constant 0 : index
      %13 = vector.load %arg5[%c0_12, %c0_13] : memref<1x128xf32, #tpu.memory_space<vmem>>, vector<1x128xf32>
      %14 = vector.broadcast %13 : vector<1x128xf32> to vector<16x128xf32>
      %15 = arith.addf %12, %14 : vector<16x128xf32>
      %c0_14 = arith.constant 0 : index
      %c0_15 = arith.constant 0 : index
      %16 = vector.load %arg6[%c0_14, %c0_15] : memref<16x128xf32, #tpu.memory_space<vmem>>, vector<16x128xf32>
      tpu.vector_store %arg6[%c0_14, %c0_15], %15 {strides = array<i32>} : memref<16x128xf32, #tpu.memory_space<vmem>>, vector<16x128xf32>,
    } else {
    }
    return
  }
  func.func @transform_0(%arg0: i32, %arg1: i32, %arg2: i32) -> (i32, i32) {
    %c0_i32 = arith.constant 0 : i32
    return %arg0, %arg2 : i32, i32
  }
  func.func @transform_1(%arg0: i32, %arg1: i32, %arg2: i32) -> (i32, i32) {
    %c0_i32 = arith.constant 0 : i32
    return %arg2, %arg1 : i32, i32
  }
  func.func @transform_2(%arg0: i32, %arg1: i32, %arg2: i32) -> (i32, i32) {
    %c0_i32 = arith.constant 0 : i32
    %c0_i32_0 = arith.constant 0 : i32
    return %c0_i32, %arg1 : i32, i32
  }
  func.func @transform_3(%arg0: i32, %arg1: i32, %arg2: i32) -> (i32, i32) {
    %c0_i32 = arith.constant 0 : i32
    return %arg0, %arg1 : i32, i32
  }
}

module attributes {stable_mosaic.version = 11 : i64} {
  func.func @_add_ln_kernel(%arg0: i32, %arg1: memref<16x32xf32, #tpu.memory_space<vmem>>, %arg2: memref<16x32xf32, #tpu.memory_space<vmem>>, %arg3: memref<1x32xf32, #tpu.memory_space<vmem>>, %arg4: memref<1x32xf32, #tpu.memory_space<vmem>>, %arg5: memref<16x32xf32, #tpu.memory_space<vmem>>) attributes {dimension_semantics = [#tpu.dimension_semantics<parallel>], iteration_bounds = array<i64: 1>, scalar_prefetch = 0 : i64, scratch_operands = 0 : i64, tpu.core_type = #tpu.core_type<tc>, window_params = [{transform_indices = @transform_0, window_bounds = array<i64: 16, 32>}, {transform_indices = @transform_1, window_bounds = array<i64: 16, 32>}, {pipeline_mode = #tpu.pipeline_mode<synchronous>, transform_indices = @transform_2, window_bounds = array<i64: 1, 32>}, {pipeline_mode = #tpu.pipeline_mode<synchronous>, transform_indices = @transform_3, window_bounds = array<i64: 1, 32>}, {transform_indices = @transform_4, window_bounds = array<i64: 16, 32>}]} {
    %c0 = arith.constant 0 : index
    %c0_0 = arith.constant 0 : index
    %0 = vector.load %arg1[%c0, %c0_0] : memref<16x32xf32, #tpu.memory_space<vmem>>, vector<16x32xf32>
    %c0_1 = arith.constant 0 : index
    %c0_2 = arith.constant 0 : index
    %1 = vector.load %arg2[%c0_1, %c0_2] : memref<16x32xf32, #tpu.memory_space<vmem>>, vector<16x32xf32>
    %2 = arith.addf %0, %1 : vector<16x32xf32>
    %cst = arith.constant dense<0.000000e+00> : vector<16xf32>
    %3 = vector.multi_reduction <add>, %2, %cst [1] : vector<16x32xf32> to vector<16xf32>
    %4 = vector.shape_cast %3 : vector<16xf32> to vector<16x1xf32>
    %cst_3 = arith.constant 3.200000e+01 : f32
    %5 = vector.broadcast %cst_3 : f32 to vector<16x1xf32>
    %6 = arith.divf %4, %5 : vector<16x1xf32>
    %7 = vector.broadcast %6 : vector<16x1xf32> to vector<16x32xf32>
    %8 = arith.subf %2, %7 : vector<16x32xf32>
    %9 = arith.mulf %8, %8 : vector<16x32xf32>
    %cst_4 = arith.constant dense<0.000000e+00> : vector<16xf32>
    %10 = vector.multi_reduction <add>, %9, %cst_4 [1] : vector<16x32xf32> to vector<16xf32>
    %11 = vector.shape_cast %10 : vector<16xf32> to vector<16x1xf32>
    %cst_5 = arith.constant 3.200000e+01 : f32
    %12 = vector.broadcast %cst_5 : f32 to vector<16x1xf32>
    %13 = arith.divf %11, %12 : vector<16x1xf32>
    %cst_6 = arith.constant 9.99999974E-6 : f32
    %14 = vector.broadcast %cst_6 : f32 to vector<16x1xf32>
    %15 = arith.addf %13, %14 : vector<16x1xf32>
    %16 = math.rsqrt %15 : vector<16x1xf32>
    %17 = vector.broadcast %16 : vector<16x1xf32> to vector<16x32xf32>
    %18 = arith.mulf %8, %17 : vector<16x32xf32>
    %c0_7 = arith.constant 0 : index
    %c0_8 = arith.constant 0 : index
    %19 = vector.load %arg3[%c0_7, %c0_8] : memref<1x32xf32, #tpu.memory_space<vmem>>, vector<1x32xf32>
    %20 = vector.broadcast %19 : vector<1x32xf32> to vector<16x32xf32>
    %21 = arith.mulf %18, %20 : vector<16x32xf32>
    %c0_9 = arith.constant 0 : index
    %c0_10 = arith.constant 0 : index
    %22 = vector.load %arg4[%c0_9, %c0_10] : memref<1x32xf32, #tpu.memory_space<vmem>>, vector<1x32xf32>
    %23 = vector.broadcast %22 : vector<1x32xf32> to vector<16x32xf32>
    %24 = arith.addf %21, %23 : vector<16x32xf32>
    %c0_11 = arith.constant 0 : index
    %c0_12 = arith.constant 0 : index
    %25 = vector.load %arg5[%c0_11, %c0_12] : memref<16x32xf32, #tpu.memory_space<vmem>>, vector<16x32xf32>
    tpu.vector_store %arg5[%c0_11, %c0_12], %24 {strides = array<i32>} : memref<16x32xf32, #tpu.memory_space<vmem>>, vector<16x32xf32>,
    return
  }
  func.func @transform_0(%arg0: i32) -> (i32, i32) {
    %c0_i32 = arith.constant 0 : i32
    %c0_i32_0 = arith.constant 0 : i32
    return %arg0, %c0_i32 : i32, i32
  }
  func.func @transform_1(%arg0: i32) -> (i32, i32) {
    %c0_i32 = arith.constant 0 : i32
    %c0_i32_0 = arith.constant 0 : i32
    return %arg0, %c0_i32 : i32, i32
  }
  func.func @transform_2(%arg0: i32) -> (i32, i32) {
    %c0_i32 = arith.constant 0 : i32
    %c0_i32_0 = arith.constant 0 : i32
    %c0_i32_1 = arith.constant 0 : i32
    return %c0_i32, %c0_i32_0 : i32, i32
  }
  func.func @transform_3(%arg0: i32) -> (i32, i32) {
    %c0_i32 = arith.constant 0 : i32
    %c0_i32_0 = arith.constant 0 : i32
    %c0_i32_1 = arith.constant 0 : i32
    return %c0_i32, %c0_i32_0 : i32, i32
  }
  func.func @transform_4(%arg0: i32) -> (i32, i32) {
    %c0_i32 = arith.constant 0 : i32
    %c0_i32_0 = arith.constant 0 : i32
    return %arg0, %c0_i32 : i32, i32
  }
}

module attributes {stable_mosaic.version = 11 : i64} {
  func.func @_attn_kernel(%arg0: i32, %arg1: memref<1x4x8x8xbf16, #tpu.memory_space<vmem>>, %arg2: memref<1x4x8x8xbf16, #tpu.memory_space<vmem>>, %arg3: memref<1x4x8x8xbf16, #tpu.memory_space<vmem>>, %arg4: memref<1x1x8xf32, #tpu.memory_space<vmem>>, %arg5: memref<1x4x8x8xf32, #tpu.memory_space<vmem>>) attributes {dimension_semantics = [#tpu.dimension_semantics<parallel>], iteration_bounds = array<i64: 2>, scalar_prefetch = 0 : i64, scratch_operands = 0 : i64, tpu.core_type = #tpu.core_type<tc>, window_params = [{transform_indices = @transform_0, window_bounds = array<i64: 1, 4, 8, 8>}, {transform_indices = @transform_1, window_bounds = array<i64: 1, 4, 8, 8>}, {transform_indices = @transform_2, window_bounds = array<i64: 1, 4, 8, 8>}, {transform_indices = @transform_3, window_bounds = array<i64: 1, 1, 8>}, {transform_indices = @transform_4, window_bounds = array<i64: 1, 4, 8, 8>}]} {
    %c0 = arith.constant 0 : index
    %c0_0 = arith.constant 0 : index
    %c0_1 = arith.constant 0 : index
    %c0_2 = arith.constant 0 : index
    %0 = vector.load %arg1[%c0, %c0_0, %c0_1, %c0_2] : memref<1x4x8x8xbf16, #tpu.memory_space<vmem>>, vector<1x4x8x8xbf16>
    %1 = vector.shape_cast %0 : vector<1x4x8x8xbf16> to vector<4x8x8xbf16>
    %c0_3 = arith.constant 0 : index
    %c0_4 = arith.constant 0 : index
    %c0_5 = arith.constant 0 : index
    %c0_6 = arith.constant 0 : index
    %2 = vector.load %arg2[%c0_3, %c0_4, %c0_5, %c0_6] : memref<1x4x8x8xbf16, #tpu.memory_space<vmem>>, vector<1x4x8x8xbf16>
    %3 = vector.shape_cast %2 : vector<1x4x8x8xbf16> to vector<4x8x8xbf16>
    %c0_7 = arith.constant 0 : index
    %c0_8 = arith.constant 0 : index
    %c0_9 = arith.constant 0 : index
    %c0_10 = arith.constant 0 : index
    %4 = vector.load %arg3[%c0_7, %c0_8, %c0_9, %c0_10] : memref<1x4x8x8xbf16, #tpu.memory_space<vmem>>, vector<1x4x8x8xbf16>
    %5 = vector.shape_cast %4 : vector<1x4x8x8xbf16> to vector<4x8x8xbf16>
    %cst = arith.constant dense<0.000000e+00> : vector<4x8x8xf32>
    %6 = tpu.matmul %1, %3, %cst {dimension_numbers = #tpu.dot_dimension_numbers<[2], [2], [1], [1], [0, 0, 0, 1, 1, 1], [0], [0]>} : vector<4x8x8xbf16>, vector<4x8x8xbf16>, vector<4x8x8xf32> -> vector<4x8x8xf32>
    %cst_11 = arith.constant 0.353553385 : f32
    %7 = vector.broadcast %cst_11 : f32 to vector<4x8x8xf32>
    %8 = arith.mulf %6, %7 : vector<4x8x8xf32>
    %c0_12 = arith.constant 0 : index
    %c0_13 = arith.constant 0 : index
    %c0_14 = arith.constant 0 : index
    %9 = vector.load %arg4[%c0_12, %c0_13, %c0_14] : memref<1x1x8xf32, #tpu.memory_space<vmem>>, vector<1x1x8xf32>
    %10 = vector.broadcast %9 : vector<1x1x8xf32> to vector<4x8x8xf32>
    %11 = arith.addf %8, %10 : vector<4x8x8xf32>
    %cst_15 = arith.constant dense<0xFF800000> : vector<4x8xf32>
    %12 = vector.multi_reduction <maximumf>, %11, %cst_15 [2] : vector<4x8x8xf32> to vector<4x8xf32>
    %13 = vector.shape_cast %12 : vector<4x8xf32> to vector<4x8x1xf32>
    %14 = vector.broadcast %13 : vector<4x8x1xf32> to vector<4x8x8xf32>
    %15 = arith.subf %11, %14 : vector<4x8x8xf32>
    %16 = math.exp %15 : vector<4x8x8xf32>
    %cst_16 = arith.constant dense<0.000000e+00> : vector<4x8xf32>
    %17 = vector.multi_reduction <add>, %16, %cst_16 [2] : vector<4x8x8xf32> to vector<4x8xf32>
    %18 = vector.shape_cast %17 : vector<4x8xf32> to vector<4x8x1xf32>
    %19 = tpu.reciprocal %18 {approx = true} : vector<4x8x1xf32> -> vector<4x8x1xf32>
    %20 = vector.broadcast %19 : vector<4x8x1xf32> to vector<4x8x8xf32>
    %21 = arith.mulf %16, %20 : vector<4x8x8xf32>
    %22 = arith.truncf %21 : vector<4x8x8xf32> to vector<4x8x8xbf16>
    %cst_17 = arith.constant dense<0.000000e+00> : vector<4x8x8xf32>
    %23 = tpu.matmul %22, %5, %cst_17 {dimension_numbers = #tpu.dot_dimension_numbers<[2], [1], [1], [2], [0, 0, 0, 1, 1, 2], [0], [0]>} : vector<4x8x8xbf16>, vector<4x8x8xbf16>, vector<4x8x8xf32> -> vector<4x8x8xf32>
    %c0_18 = arith.constant 0 : index
    %c0_19 = arith.constant 0 : index
    %c0_20 = arith.constant 0 : index
    %c0_21 = arith.constant 0 : index
    %24 = vector.load %arg5[%c0_18, %c0_19, %c0_20, %c0_21] : memref<1x4x8x8xf32, #tpu.memory_space<vmem>>, vector<1x4x8x8xf32>
    %25 = vector.shape_cast %24 : vector<1x4x8x8xf32> to vector<4x8x8xf32>
    %26 = vector.shape_cast %23 : vector<4x8x8xf32> to vector<1x4x8x8xf32>
    tpu.vector_store %arg5[%c0_18, %c0_19, %c0_20, %c0_21], %26 {strides = array<i32>} : memref<1x4x8x8xf32, #tpu.memory_space<vmem>>, vector<1x4x8x8xf32>,
    return
  }
  func.func @transform_0(%arg0: i32) -> (i32, i32, i32, i32) {
    %c0_i32 = arith.constant 0 : i32
    %c0_i32_0 = arith.constant 0 : i32
    %c0_i32_1 = arith.constant 0 : i32
    %c0_i32_2 = arith.constant 0 : i32
    return %arg0, %c0_i32, %c0_i32_0, %c0_i32_1 : i32, i32, i32, i32
  }
  func.func @transform_1(%arg0: i32) -> (i32, i32, i32, i32) {
    %c0_i32 = arith.constant 0 : i32
    %c0_i32_0 = arith.constant 0 : i32
    %c0_i32_1 = arith.constant 0 : i32
    %c0_i32_2 = arith.constant 0 : i32
    return %arg0, %c0_i32, %c0_i32_0, %c0_i32_1 : i32, i32, i32, i32
  }
  func.func @transform_2(%arg0: i32) -> (i32, i32, i32, i32) {
    %c0_i32 = arith.constant 0 : i32
    %c0_i32_0 = arith.constant 0 : i32
    %c0_i32_1 = arith.constant 0 : i32
    %c0_i32_2 = arith.constant 0 : i32
    return %arg0, %c0_i32, %c0_i32_0, %c0_i32_1 : i32, i32, i32, i32
  }
  func.func @transform_3(%arg0: i32) -> (i32, i32, i32) {
    %c0_i32 = arith.constant 0 : i32
    %c0_i32_0 = arith.constant 0 : i32
    %c0_i32_1 = arith.constant 0 : i32
    return %arg0, %c0_i32, %c0_i32_0 : i32, i32, i32
  }
  func.func @transform_4(%arg0: i32) -> (i32, i32, i32, i32) {
    %c0_i32 = arith.constant 0 : i32
    %c0_i32_0 = arith.constant 0 : i32
    %c0_i32_1 = arith.constant 0 : i32
    %c0_i32_2 = arith.constant 0 : i32
    return %arg0, %c0_i32, %c0_i32_0, %c0_i32_1 : i32, i32, i32, i32
  }
}

module attributes {stable_mosaic.version = 11 : i64} {
  func.func @_ffn_kernel(%arg0: i32, %arg1: memref<16x32xbf16, #tpu.memory_space<vmem>>, %arg2: memref<32x64xbf16, #tpu.memory_space<vmem>>, %arg3: memref<1x64xf32, #tpu.memory_space<vmem>>, %arg4: memref<64x32xbf16, #tpu.memory_space<vmem>>, %arg5: memref<1x32xf32, #tpu.memory_space<vmem>>, %arg6: memref<16x32xf32, #tpu.memory_space<vmem>>) attributes {dimension_semantics = [#tpu.dimension_semantics<parallel>], iteration_bounds = array<i64: 1>, scalar_prefetch = 0 : i64, scratch_operands = 0 : i64, tpu.core_type = #tpu.core_type<tc>, window_params = [{transform_indices = @transform_0, window_bounds = array<i64: 16, 32>}, {pipeline_mode = #tpu.pipeline_mode<synchronous>, transform_indices = @transform_1, window_bounds = array<i64: 32, 64>}, {pipeline_mode = #tpu.pipeline_mode<synchronous>, transform_indices = @transform_2, window_bounds = array<i64: 1, 64>}, {pipeline_mode = #tpu.pipeline_mode<synchronous>, transform_indices = @transform_3, window_bounds = array<i64: 64, 32>}, {pipeline_mode = #tpu.pipeline_mode<synchronous>, transform_indices = @transform_4, window_bounds = array<i64: 1, 32>}, {transform_indices = @transform_5, window_bounds = array<i64: 16, 32>}]} {
    %c0 = arith.constant 0 : index
    %c0_0 = arith.constant 0 : index
    %0 = vector.load %arg1[%c0, %c0_0] : memref<16x32xbf16, #tpu.memory_space<vmem>>, vector<16x32xbf16>
    %c0_1 = arith.constant 0 : index
    %c0_2 = arith.constant 0 : index
    %1 = vector.load %arg2[%c0_1, %c0_2] : memref<32x64xbf16, #tpu.memory_space<vmem>>, vector<32x64xbf16>
    %cst = arith.constant dense<0.000000e+00> : vector<16x64xf32>
    %2 = tpu.matmul %0, %1, %cst {dimension_numbers = #tpu.dot_dimension_numbers<[1], [0], [0], [1], [0, 0, 1, 1], [], []>} : vector<16x32xbf16>, vector<32x64xbf16>, vector<16x64xf32> -> vector<16x64xf32>
    %c0_3 = arith.constant 0 : index
    %c0_4 = arith.constant 0 : index
    %3 = vector.load %arg3[%c0_3, %c0_4] : memref<1x64xf32, #tpu.memory_space<vmem>>, vector<1x64xf32>
    %4 = vector.broadcast %3 : vector<1x64xf32> to vector<16x64xf32>
    %5 = arith.addf %2, %4 : vector<16x64xf32>
    %cst_5 = arith.constant 0.000000e+00 : f32
    %6 = vector.broadcast %cst_5 : f32 to vector<16x64xf32>
    %7 = arith.maximumf %5, %6 : vector<16x64xf32>
    %8 = arith.truncf %7 : vector<16x64xf32> to vector<16x64xbf16>
    %c0_6 = arith.constant 0 : index
    %c0_7 = arith.constant 0 : index
    %9 = vector.load %arg4[%c0_6, %c0_7] : memref<64x32xbf16, #tpu.memory_space<vmem>>, vector<64x32xbf16>
    %cst_8 = arith.constant dense<0.000000e+00> : vector<16x32xf32>
    %10 = tpu.matmul %8, %9, %cst_8 {dimension_numbers = #tpu.dot_dimension_numbers<[1], [0], [0], [1], [0, 0, 1, 1], [], []>} : vector<16x64xbf16>, vector<64x32xbf16>, vector<16x32xf32> -> vector<16x32xf32>
    %c0_9 = arith.constant 0 : index
    %c0_10 = arith.constant 0 : index
    %11 = vector.load %arg5[%c0_9, %c0_10] : memref<1x32xf32, #tpu.memory_space<vmem>>, vector<1x32xf32>
    %12 = vector.broadcast %11 : vector<1x32xf32> to vector<16x32xf32>
    %13 = arith.addf %10, %12 : vector<16x32xf32>
    %c0_11 = arith.constant 0 : index
    %c0_12 = arith.constant 0 : index
    %14 = vector.load %arg6[%c0_11, %c0_12] : memref<16x32xf32, #tpu.memory_space<vmem>>, vector<16x32xf32>
    tpu.vector_store %arg6[%c0_11, %c0_12], %13 {strides = array<i32>} : memref<16x32xf32, #tpu.memory_space<vmem>>, vector<16x32xf32>,
    return
  }
  func.func @transform_0(%arg0: i32) -> (i32, i32) {
    %c0_i32 = arith.constant 0 : i32
    %c0_i32_0 = arith.constant 0 : i32
    return %arg0, %c0_i32 : i32, i32
  }
  func.func @transform_1(%arg0: i32) -> (i32, i32) {
    %c0_i32 = arith.constant 0 : i32
    %c0_i32_0 = arith.constant 0 : i32
    %c0_i32_1 = arith.constant 0 : i32
    return %c0_i32, %c0_i32_0 : i32, i32
  }
  func.func @transform_2(%arg0: i32) -> (i32, i32) {
    %c0_i32 = arith.constant 0 : i32
    %c0_i32_0 = arith.constant 0 : i32
    %c0_i32_1 = arith.constant 0 : i32
    return %c0_i32, %c0_i32_0 : i32, i32
  }
  func.func @transform_3(%arg0: i32) -> (i32, i32) {
    %c0_i32 = arith.constant 0 : i32
    %c0_i32_0 = arith.constant 0 : i32
    %c0_i32_1 = arith.constant 0 : i32
    return %c0_i32, %c0_i32_0 : i32, i32
  }
  func.func @transform_4(%arg0: i32) -> (i32, i32) {
    %c0_i32 = arith.constant 0 : i32
    %c0_i32_0 = arith.constant 0 : i32
    %c0_i32_1 = arith.constant 0 : i32
    return %c0_i32, %c0_i32_0 : i32, i32
  }
  func.func @transform_5(%arg0: i32) -> (i32, i32) {
    %c0_i32 = arith.constant 0 : i32
    %c0_i32_0 = arith.constant 0 : i32
    return %arg0, %c0_i32 : i32, i32
  }
}

</mosaic_0001>

<bundles_post_ra>
// kernel: transformer_forward.47
= control target key start
LH: loop header
LB: loop body
LE: loop exit
PB: predicated region body
PF: predicated region fallthrough
CT: control target
= control target key end

     0   :  { %vm46_vm0 = vcmask 261120   ;;  %s144_s1 = inlined_call_operand.vmem [shape: bf16[32,128], index: 1, kind: input, shape index: {}]   ;;  %s145_s2 = inlined_call_operand.vmem [shape: f32[1,128], index: 2, kind: input, shape index: {}]   ;;  %s146_s0 = inlined_call_operand.vmem [shape: bf16[16,32], index: 0, kind: input, shape index: {}]   ;;  %s147_s3 = inlined_call_operand.vmem [shape: bf16[16,128], index: 3, kind: output, shape index: {}]  }
   0x1   :  { %v102_v0 = vld [vmem:[%s144_s1 + $0x8] sm:$0xff]  ;;  %v101_v1 = vld [vmem:[%s144_s1] sm:$0xff] }
   0x2   :  { %56 = vmatpush.bf16.msra.mxu0 %v102_v0  ;;  %v100_v2 = vld [vmem:[%s146_s0] sm:$0xff] }
   0x3   :  { %v108_v4 = vld [vmem:[%s145_s2] ss:$0 sm:$0xff] }
   0x6   :  { %57 = vmatpush.bf16.msra.mxu0 %v101_v1 }
   0x9   :  { %99 = vmatmul.msk.bf16.vlgmr.msra.gmra.mxu0 %vm46_vm0, %v100_v2 }
  0x86   :  { %v59_v3 = vpop.f32.mrf.mxu0 }
  0x87   :  { %v77_v6 = vadd.f32 %v108_v4, %v59_v3 }
  0x8e   :  { %v61_v5 = vpop.f32.mrf.mxu0 }
  0x8f   :  { %v78_v7 = vadd.f32 %v108_v4, %v61_v5 }
  0x91   :  { %v106_v8 = vpack.c.bf16 %v78_v7, %v77_v6 }
  0x93   :  { %107 = vst [vmem:[%s147_s3] sm:$0xff] %v106_v8  }

// kernel: transformer_forward.49
= control target key start
LH: loop header
LB: loop body
LE: loop exit
PB: predicated region body
PF: predicated region fallthrough
CT: control target
= control target key end

     0   :  { %vm46_vm0 = vcmask 261120   ;;  %s140_s1 = inlined_call_operand.vmem [shape: bf16[32,128], index: 1, kind: input, shape index: {}]   ;;  %s141_s2 = inlined_call_operand.vmem [shape: f32[1,128], index: 2, kind: input, shape index: {}]   ;;  %s142_s0 = inlined_call_operand.vmem [shape: bf16[16,32], index: 0, kind: input, shape index: {}]   ;;  %s143_s3 = inlined_call_operand.vmem [shape: f32[16,128], index: 3, kind: output, shape index: {}]  }
   0x1   :  { %v100_v0 = vld [vmem:[%s140_s1 + $0x8] sm:$0xff]  ;;  %v99_v1 = vld [vmem:[%s140_s1] sm:$0xff] }
   0x2   :  { %56 = vmatpush.bf16.msra.mxu0 %v100_v0  ;;  %v98_v2 = vld [vmem:[%s142_s0] sm:$0xff] }
   0x3   :  { %v101_v3 = vld [vmem:[%s141_s2] ss:$0 sm:$0xff] }
   0x6   :  { %57 = vmatpush.bf16.msra.mxu0 %v99_v1 }
   0x9   :  { %97 = vmatmul.msk.bf16.vlgmr.msra.gmra.mxu0 %vm46_vm0, %v98_v2 }
  0x86   :  { %v59_v4 = vpop.f32.mrf.mxu0 }
  0x87   :  { %v77_v5 = vadd.f32 %v101_v3, %v59_v4 }
  0x89   :  { %79 = vst [vmem:[%s143_s3] sm:$0xff] %v77_v5 }
  0x8e   :  { %v61_v6 = vpop.f32.mrf.mxu0 }
  0x8f   :  { %v78_v7 = vadd.f32 %v101_v3, %v61_v6 }
  0x91   :  { %80 = vst [vmem:[%s143_s3 + $0x8] sm:$0xff] %v78_v7 }

// kernel: transformer_forward.50
= control target key start
LH: loop header
LB: loop body
LE: loop exit
PB: predicated region body
PF: predicated region fallthrough
CT: control target
= control target key end

     0   :  { %vm23_vm0 = vcmask 261120   ;;  %v102_v8 = vmov 32.0   ;;  %s158_s0 = inlined_call_operand.vmem [shape: f32[16,32], index: 0, kind: input, shape index: {}]   ;;  %s159_s1 = inlined_call_operand.vmem [shape: f32[16,32], index: 1, kind: input, shape index: {}]   ;;  %s160_s2 = inlined_call_operand.vmem [shape: f32[1,32], index: 2, kind: input, shape index: {}]   ;;  %s161_s3 = inlined_call_operand.vmem [shape: f32[1,32], index: 3, kind: input, shape index: {}]   ;;  %s162_s4 = inlined_call_operand.vmem [shape: f32[16,32], index: 4, kind: output, shape index: {}]  }
   0x1   :  { %v17_v0 = vld [vmem:[%s158_s0] sm:$0xff]  ;;  %v18_v3 = vld [vmem:[%s158_s0 + $0x8] sm:$0xff]  ;;  %96 = vrcp.f32 %v102_v8 }
   0x2   :  { %v19_v1 = vld [vmem:[%s159_s1] sm:$0xff]  ;;  %v20_v4 = vld [vmem:[%s159_s1 + $0x8] sm:$0xff] }
   0x3   :  { %v21_v2 = vadd.f32 %v19_v1, %v17_v0  ;;  %v22_v6 = vadd.f32 %v20_v4, %v18_v3  ;;  %v94_v39 = vld [vmem:[%s160_s2] ss:$0 sm:$0xff] }
   0x4   :  { %v95_v42 = vld [vmem:[%s161_s3] ss:$0 sm:$0xff] }
   0x5   :  { %v24_v5 = vsel %vm23_vm0, %v21_v2, 0.0  ;;  %v27_v7 = vsel %vm23_vm0, %v22_v6, 0.0 }
   0x6   :  { %25 = vadd.xlane.f32.xlu0 %v24_v5 }
   0x7   :  { %v97_v9 = vpop.eup %96 }
   0x8   :  { %v31_v10 = vmul.f32 32.0, %v97_v9  ;;  %vm35_vm1 = vweird.f32 %v97_v9 }
   0xa   :  { %v32_v11 = vsub.f32 1.0, %v31_v10 }
   0xc   :  { %v33_v12 = vmul.f32 %v97_v9, %v32_v11 }
   0xe   :  { %28 = vadd.xlane.f32.xlu0 %v27_v7  ;;  %v34_v13 = vadd.f32 %v97_v9, %v33_v12 }
  0x10   :  { %v36_v14 = vsel %vm35_vm1, %v97_v9, %v34_v13 }
  0x79   :  { %v26_v15 = vpop.xlane.xlu0 %25 }
  0x7a   :  { %v37_v16 = vmul.f32 %v36_v14, %v26_v15 }
  0x7c   :  { %v39_v17 = vsub.f32 %v21_v2, %v37_v16 }
  0x7e   :  { %v41_v18 = vmul.f32 %v39_v17, %v39_v17 }
  0x80   :  { %v43_v19 = vsel %vm23_vm0, %v41_v18, 0.0 }
  0x81   :  { %44 = vadd.xlane.f32.xlu1 %v43_v19  ;;  %v29_v20 = vpop.xlane.xlu0 %28 }
  0x82   :  { %v38_v21 = vmul.f32 %v36_v14, %v29_v20 }
  0x84   :  { %v40_v22 = vsub.f32 %v22_v6, %v38_v21 }
  0x86   :  { %v42_v23 = vmul.f32 %v40_v22, %v40_v22 }
  0x88   :  { %v46_v24 = vsel %vm23_vm0, %v42_v23, 0.0 }
  0x89   :  { %47 = vadd.xlane.f32.xlu1 %v46_v24 }
  0xf4   :  { %v45_v25 = vpop.xlane.xlu1 %44 }
  0xf5   :  { %v49_v26 = vmul.f32 %v45_v25, %v36_v14 }
  0xf7   :  { %v51_v27 = vadd.f32 1e-05, %v49_v26 }
  0xf9   :  { %98 = vrsqrt.f32 %v51_v27  ;;  %vm59_vm3 = vweird.f32 %v51_v27 }
  0xfc   :  { %v48_v28 = vpop.xlane.xlu1 %47 }
  0xfd   :  { %v50_v29 = vmul.f32 %v48_v28, %v36_v14 }
  0xff   :  { %v99_v30 = vpop.eup %98  ;;  %v52_v31 = vadd.f32 1e-05, %v50_v29 }
 0x100   :  { %v54_v32 = vmul.f32 %v99_v30, %v51_v27  ;;  %vm60_vm2 = vweird.f32 %v99_v30 }
 0x101   :  { %100 = vrsqrt.f32 %v52_v31  ;;  %vm61_vm4 = vmor %vm59_vm3, %vm60_vm2  ;;  %vm69_vm6 = vweird.f32 %v52_v31 }
 0x102   :  { %v55_v33 = vmul.f32 %v99_v30, %v54_v32 }
 0x104   :  { %v56_v34 = vmul.f32 0.5, %v55_v33 }
 0x106   :  { %v57_v35 = vsub.f32 1.5, %v56_v34 }
 0x107   :  { %v101_v36 = vpop.eup %100 }
 0x108   :  { %v58_v37 = vmul.f32 %v99_v30, %v57_v35  ;;  %v64_v38 = vmul.f32 %v101_v36, %v52_v31  ;;  %vm70_vm5 = vweird.f32 %v101_v36 }
 0x109   :  { %vm71_vm7 = vmor %vm69_vm6, %vm70_vm5 }
 0x10a   :  { %v62_v40 = vsel %vm61_vm4, %v99_v30, %v58_v37  ;;  %v65_v41 = vmul.f32 %v101_v36, %v64_v38 }
 0x10b   :  { %v73_v43 = vmul.f32 %v62_v40, %v39_v17 }
 0x10c   :  { %v66_v44 = vmul.f32 0.5, %v65_v41 }
 0x10d   :  { %v79_v45 = vmul.f32 %v94_v39, %v73_v43 }
 0x10e   :  { %v67_v46 = vsub.f32 1.5, %v66_v44 }
 0x10f   :  { %v85_v47 = vadd.f32 %v95_v42, %v79_v45 }
 0x110   :  { %v68_v48 = vmul.f32 %v101_v36, %v67_v46 }
 0x111   :  { %87 = vst.msk [vmem:[%s162_s4] sm:$0xff] %vm23_vm0, %v85_v47 }
 0x112   :  { %v72_v49 = vsel %vm71_vm7, %v101_v36, %v68_v48 }
 0x113   :  { %v74_v50 = vmul.f32 %v72_v49, %v40_v22 }
 0x115   :  { %v80_v51 = vmul.f32 %v94_v39, %v74_v50 }
 0x117   :  { %v86_v52 = vadd.f32 %v95_v42, %v80_v51 }
 0x119   :  { %88 = vst.msk [vmem:[%s162_s4 + $0x8] sm:$0xff] %vm23_vm0, %v86_v52 }

// kernel: transformer_forward.48
= control target key start
LH: loop header
LB: loop body
LE: loop exit
PB: predicated region body
PF: predicated region fallthrough
CT: control target
= control target key end

     0   :  { %s667_s15 = smov 0   ;;  %s731_s0 = inlined_call_operand.vmem [shape: bf16[2,4,8,8], index: 0, kind: input, shape index: {}]   ;;  %s732_s1 = inlined_call_operand.vmem [shape: bf16[2,4,8,8], index: 1, kind: input, shape index: {}]   ;;  %s733_s2 = inlined_call_operand.vmem [shape: bf16[2,4,8,8], index: 2, kind: input, shape index: {}]   ;;  %s734_s3 = inlined_call_operand.vmem [shape: f32[2,1,8], index: 3, kind: input, shape index: {}]   ;;  %s735_s4 = inlined_call_operand.vmem [shape: f32[2,4,8,8], index: 4, kind: output, shape index: {}]  }
   0x1 LB: > { %s582_s16 = sadd.s32 4294967295, %s640_s15   ;;  %p586_p0 = scmp.ge.s32.totalorder %s640_s15, 1  ;;  %s640_s15 = sphi %s667_s15, %s14_s15  }
   0x2   : > { %p190_p1 = scmp.lt.s32.totalorder %s640_s15, 3 }
   0x4   : > { %p191_p2 = pnand %p586_p0, %p190_p1 }
   0x5   : > { %p229_p3 = scmp.lt.s32.totalorder (!%p191_p2), %s582_s16, 1 }
   0x6   : > { %194 = sbr.rel (%p191_p2) target bundleno = 564 (0x234), region = 36 }
   0xb   : > { %s737_s16 = smov (!%p229_p3, %s582_s16), 1  ;;  %vm265_vm0 = vcmask 64512   ;;  %v354_v12 = vlaneseq  ;;  %vm416_vm2 = vcmask 1043456  }
   0xc   : > { %s678_s17 = sshll.u32 %s737_s16, 4  ;;  %s246_s20 = scalar_lea.vmem %s734_s3, %s737_s16 }
   0xd   : > { %s238_s23 = scalar_lea.vmem %s732_s1, %s678_s17  ;;  %s233_s26 = scalar_lea.vmem %s731_s0, %s678_s17  ;;  %v355_v13 = vshrl.u32 %v354_v12, 7  ;;  %v357_v14 = vand.u32 127, %v354_v12  ;;  %v617_v15 = vld [vmem:[%s246_s20] ss:$0 sm:$0xff] }
   0xe   : > { %v257_v0 = vld [vmem:[%s238_s23] sm:$0xf]  ;;  %v259_v1 = vld [vmem:[%s238_s23 + $0x8] sm:$0xf]  ;;  %v260_v2 = vld [vmem:[%s238_s23 + $0xc] sm:$0xf]  ;;  %s243_s29 = scalar_lea.vmem %s733_s2, %s678_s17 }
   0xf   : > { %v270_v3 = vsel %vm265_vm0, %v257_v0, 0  ;;  %v308_v4 = vsel %vm265_vm0, %v259_v1, 0  ;;  %v327_v5 = vsel %vm265_vm0, %v260_v2, 0  ;;  %v258_v6 = vld [vmem:[%s238_s23 + $0x4] sm:$0xf]  ;;  %vm358_vm1 = vcmp.le.s32.totalorder %v357_v14, %v355_v13  ;;  %s608_s30 = sshll.u32 %s737_s16, 5 }
  0x10   : > { %279 = vmatpush.bf16.xpose.msra.mxu0 %v270_v3  ;;  %317 = vmatpush.bf16.xpose.msra.mxu2 %v308_v4  ;;  %v289_v7 = vsel %vm265_vm0, %v258_v6, 0  ;;  %v253_v8 = vld [vmem:[%s233_s26] sm:$0xf]  ;;  %v255_v9 = vld [vmem:[%s233_s26 + $0x8] sm:$0xf]  ;;  %s251_s7 = scalar_lea.vmem %s735_s4, %s608_s30 }
  0x11   : > { %336 = vmatpush.bf16.xpose.msra.mxu3 %v327_v5  ;;  %298 = vmatpush.bf16.xpose.msra.mxu1 %v289_v7  ;;  %v256_v10 = vld [vmem:[%s233_s26 + $0xc] sm:$0xf]  ;;  %v254_v11 = vld [vmem:[%s233_s26 + $0x4] sm:$0xf]  ;;  %v261_v60 = vld [vmem:[%s243_s29] sm:$0xf] }
  0x12   : > { %v418_v61 = vsel %vm416_vm2, %v261_v60, 0  ;;  %v263_v62 = vld [vmem:[%s243_s29 + $0x8] sm:$0xf]  ;;  %v262_v0 = vld [vmem:[%s243_s29 + $0x4] sm:$0xf] }
  0x13   : > { %v456_v63 = vsel %vm416_vm2, %v263_v62, 0  ;;  %v437_v1 = vsel %vm416_vm2, %v262_v0, 0  ;;  %v264_v2 = vld [vmem:[%s243_s29 + $0xc] sm:$0xf] }
  0x14   : > { %v475_v3 = vsel %vm416_vm2, %v264_v2, 0 }
  0x17   : > { %595 = vmatmul.msk.bf16.vlgmr.msra.gmra.mxu0 %vm265_vm0, %v253_v8  ;;  %597 = vmatmul.msk.bf16.vlgmr.msra.gmra.mxu2 %vm265_vm0, %v255_v9 }
  0x18   : > { %598 = vmatmul.msk.bf16.vlgmr.msra.gmra.mxu3 %vm265_vm0, %v256_v10  ;;  %596 = vmatmul.msk.bf16.vlgmr.msra.gmra.mxu1 %vm265_vm0, %v254_v11 }
  0x19   : > { %427 = vmatpush.bf16.msrb.mxu0 %v418_v61  ;;  %465 = vmatpush.bf16.msrb.mxu2 %v456_v63 }
  0x1a   : > { %446 = vmatpush.bf16.msrb.mxu1 %v437_v1  ;;  %484 = vmatpush.bf16.msrb.mxu3 %v475_v3 }
  0x94   : > { %v281_v16 = vpop.f32.mrf.mxu0 }
  0x95   : > { %v342_v17 = vmul.f32 0.35355338, %v281_v16  ;;  %v300_v18 = vpop.f32.mrf.mxu1 }
  0x96   : > { %v343_v20 = vmul.f32 0.35355338, %v300_v18 }
  0x97   : > { %v350_v19 = vadd.f32 %v617_v15, %v342_v17 }
  0x98   : > { %v351_v22 = vadd.f32 %v617_v15, %v343_v20 }
  0x99   : > { %v361_v21 = vsel %vm358_vm1, %v350_v19, -1e+09 }
  0x9a   : > { %v319_v23 = vpop.f32.mrf.mxu2  ;;  %v365_v24 = vsel %vm265_vm0, %v361_v21, -inf  ;;  %v362_v30 = vsel %vm358_vm1, %v351_v22, -1e+09 }
  0x9b   : > { %v344_v25 = vmul.f32 0.35355338, %v319_v23  ;;  %v338_v26 = vpop.f32.mrf.mxu3  ;;  %366 = vmax.xlane.f32.xlu1 %v365_v24  ;;  %v368_v35 = vsel %vm265_vm0, %v362_v30, -inf }
  0x9c   : > { %v345_v27 = vmul.f32 0.35355338, %v338_v26  ;;  %v283_v28 = vpop.f32.mrf.mxu0 }
  0x9d   : > { %v352_v29 = vadd.f32 %v617_v15, %v344_v25  ;;  %v302_v31 = vpop.f32.mrf.mxu1 }
  0x9e   : > { %v353_v32 = vadd.f32 %v617_v15, %v345_v27 }
  0x9f   : > { %v363_v33 = vsel %vm358_vm1, %v352_v29, -1e+09 }
  0xa0   : > { %v371_v34 = vsel %vm265_vm0, %v363_v33, -inf  ;;  %v364_v38 = vsel %vm358_vm1, %v353_v32, -1e+09 }
  0xa1   : > { %372 = vmax.xlane.f32.xlu0 %v371_v34  ;;  %v374_v39 = vsel %vm265_vm0, %v364_v38, -inf }
  0xa2   : > { %v321_v36 = vpop.f32.mrf.mxu2 }
  0xa3   : > { %v340_v37 = vpop.f32.mrf.mxu3  ;;  %369 = vmax.xlane.f32.xlu1 %v368_v35 }
  0xa9   : > { %375 = vmax.xlane.f32.xlu0 %v374_v39 }
 0x10e   : > { %v367_v40 = vpop.xlane.xlu1 %366 }
 0x10f   : > { %v377_v41 = vsub.f32 %v361_v21, %v367_v40 }
 0x111   : > { %v381_v42 = vmul.f32 1.442695, %v377_v41 }
 0x113   : > { %618 = vpow2.f32 %v381_v42 }
 0x114   : > { %v373_v43 = vpop.xlane.xlu0 %372 }
 0x115   : > { %v379_v44 = vsub.f32 %v363_v33, %v373_v43 }
 0x116   : > { %v370_v45 = vpop.xlane.xlu1 %369 }
 0x117   : > { %v385_v46 = vmul.f32 1.442695, %v379_v44  ;;  %v378_v47 = vsub.f32 %v362_v30, %v370_v45 }
 0x119   : > { %v619_v48 = vpop.eup %618  ;;  %620 = vpow2.f32 %v385_v46  ;;  %v383_v49 = vmul.f32 1.442695, %v378_v47 }
 0x11a   : > { %v389_v50 = vsel %vm265_vm0, %v619_v48, 0.0 }
 0x11b   : > { %622 = vpow2.f32 %v383_v49  ;;  %390 = vadd.xlane.f32.xlu0 %v389_v50 }
 0x11c   : > { %v376_v51 = vpop.xlane.xlu0 %375 }
 0x11d   : > { %v380_v52 = vsub.f32 %v364_v38, %v376_v51 }
 0x11f   : > { %v621_v53 = vpop.eup %620  ;;  %v387_v54 = vmul.f32 1.442695, %v380_v52 }
 0x120   : > { %v395_v55 = vsel %vm265_vm0, %v621_v53, 0.0 }
 0x121   : > { %v623_v56 = vpop.eup %622  ;;  %624 = vpow2.f32 %v387_v54  ;;  %396 = vadd.xlane.f32.xlu2 %v395_v55 }
 0x122   : > { %v392_v57 = vsel %vm265_vm0, %v623_v56, 0.0 }
 0x123   : > { %393 = vadd.xlane.f32.xlu1 %v392_v57 }
 0x127   : > { %v625_v58 = vpop.eup %624 }
 0x128   : > { %v398_v59 = vsel %vm265_vm0, %v625_v58, 0.0 }
 0x129   : > { %399 = vadd.xlane.f32.xlu2 %v398_v59 }
 0x18e   : > { %v391_v4 = vpop.xlane.xlu0 %390 }
 0x18f   : > { %626 = vrcp.f32 %v391_v4 }
 0x194   : > { %v397_v5 = vpop.xlane.xlu2 %396 }
 0x195   : > { %v627_v6 = vpop.eup %626  ;;  %628 = vrcp.f32 %v397_v5 }
 0x196   : > { %v405_v7 = vmul.f32 %v627_v6, %v619_v48  ;;  %v394_v8 = vpop.xlane.xlu1 %393 }
 0x197   : > { %630 = vrcp.f32 %v394_v8 }
 0x198   : > { %v409_v9 = vpack.c.bf16 %v405_v7, %v405_v7 }
 0x19a   : > { %599 = vmatmul.msk.bf16.vlgmr.msrb.gmra.mxu0 %vm265_vm0, %v409_v9 }
 0x19b   : > { %v629_v10 = vpop.eup %628 }
 0x19c   : > { %v407_v11 = vmul.f32 %v629_v10, %v621_v53  ;;  %v400_v12 = vpop.xlane.xlu2 %399 }
 0x19d   : > { %v631_v13 = vpop.eup %630  ;;  %632 = vrcp.f32 %v400_v12 }
 0x19e   : > { %v406_v14 = vmul.f32 %v631_v13, %v623_v56  ;;  %v411_v15 = vpack.c.bf16 %v407_v11, %v407_v11 }
 0x1a0   : > { %v410_v16 = vpack.c.bf16 %v406_v14, %v406_v14  ;;  %601 = vmatmul.msk.bf16.vlgmr.msrb.gmra.mxu2 %vm265_vm0, %v411_v15 }
 0x1a2   : > { %600 = vmatmul.msk.bf16.vlgmr.msrb.gmra.mxu1 %vm265_vm0, %v410_v16 }
 0x1a3   : > { %v633_v17 = vpop.eup %632 }
 0x1a4   : > { %v408_v18 = vmul.f32 %v633_v17, %v625_v58 }
 0x1a6   : > { %v412_v19 = vpack.c.bf16 %v408_v18, %v408_v18 }
 0x1a8   : > { %602 = vmatmul.msk.bf16.vlgmr.msrb.gmra.mxu3 %vm265_vm0, %v412_v19 }
 0x217   : > { %v429_v20 = vpop.f32.mrf.mxu0 }
 0x218   : > { %490 = vst.msk [vmem:[%s251_s7] sm:$0xff] %vm265_vm0, %v429_v20 }
 0x21f   : > { %v431_v21 = vpop.f32.mrf.mxu0  ;;  %v448_v22 = vpop.f32.mrf.mxu1 }
 0x220   : > { %491 = vst.msk [vmem:[%s251_s7 + $0x8] sm:$0xff] %vm265_vm0, %v448_v22 }
 0x223   : > { %v467_v23 = vpop.f32.mrf.mxu2 }
 0x224   : > { %492 = vst.msk [vmem:[%s251_s7 + $0x10] sm:$0xff] %vm265_vm0, %v467_v23 }
 0x227   : > { %v450_v24 = vpop.f32.mrf.mxu1 }
 0x22b   : > { %v469_v25 = vpop.f32.mrf.mxu2  ;;  %v486_v26 = vpop.f32.mrf.mxu3 }
 0x22c   : > { %493 = vst.msk [vmem:[%s251_s7 + $0x18] sm:$0xff] %vm265_vm0, %v486_v26 }
 0x233   : > { %v488_v27 = vpop.f32.mrf.mxu3 }
 0x234 PF: > { %s14_s15 = sadd.s32 1, %s640_s15  }
 0x235   : > { %p11_p4 = scmp.ge.s32.totalorder %s14_s15, 4  }
 0x237   :  { %13 = sbr.rel (!%p11_p4) target bundleno = 1 (0x1), region = 75 }

// kernel: transformer_forward.36
= control target key start
LH: loop header
LB: loop body
LE: loop exit
PB: predicated region body
PF: predicated region fallthrough
CT: control target
= control target key end

     0   :  { %s656_s15 = smov 0   ;;  %s716_s0 = inlined_call_operand.vmem [shape: bf16[2,4,8,8], index: 0, kind: input, shape index: {}]   ;;  %s717_s1 = inlined_call_operand.vmem [shape: bf16[2,4,8,8], index: 1, kind: input, shape index: {}]   ;;  %s718_s2 = inlined_call_operand.vmem [shape: bf16[2,4,8,8], index: 2, kind: input, shape index: {}]   ;;  %s719_s3 = inlined_call_operand.vmem [shape: f32[2,1,8], index: 3, kind: input, shape index: {}]   ;;  %s720_s4 = inlined_call_operand.vmem [shape: f32[2,4,8,8], index: 4, kind: output, shape index: {}]  }
   0x1 LB: > { %s571_s16 = sadd.s32 4294967295, %s629_s15   ;;  %p575_p0 = scmp.ge.s32.totalorder %s629_s15, 1  ;;  %s629_s15 = sphi %s656_s15, %s14_s15  }
   0x2   : > { %p190_p1 = scmp.lt.s32.totalorder %s629_s15, 3 }
   0x4   : > { %p191_p2 = pnand %p575_p0, %p190_p1 }
   0x5   : > { %p229_p3 = scmp.lt.s32.totalorder (!%p191_p2), %s571_s16, 1 }
   0x6   : > { %194 = sbr.rel (%p191_p2) target bundleno = 563 (0x233), region = 36 }
   0xb   : > { %s722_s16 = smov (!%p229_p3, %s571_s16), 1  ;;  %vm265_vm0 = vcmask 64512   ;;  %vm405_vm1 = vcmask 1043456  }
   0xc   : > { %s667_s17 = sshll.u32 %s722_s16, 4  ;;  %s246_s26 = scalar_lea.vmem %s719_s3, %s722_s16 }
   0xd   : > { %s238_s20 = scalar_lea.vmem %s717_s1, %s667_s17  ;;  %s233_s23 = scalar_lea.vmem %s716_s0, %s667_s17  ;;  %v606_v12 = vld [vmem:[%s246_s26] ss:$0 sm:$0xff] }
   0xe   : > { %v257_v0 = vld [vmem:[%s238_s20] sm:$0xf]  ;;  %v259_v1 = vld [vmem:[%s238_s20 + $0x8] sm:$0xf]  ;;  %v260_v2 = vld [vmem:[%s238_s20 + $0xc] sm:$0xf]  ;;  %s243_s29 = scalar_lea.vmem %s718_s2, %s667_s17 }
   0xf   : > { %v270_v3 = vsel %vm265_vm0, %v257_v0, 0  ;;  %v308_v4 = vsel %vm265_vm0, %v259_v1, 0  ;;  %v327_v5 = vsel %vm265_vm0, %v260_v2, 0  ;;  %v258_v6 = vld [vmem:[%s238_s20 + $0x4] sm:$0xf]  ;;  %s597_s30 = sshll.u32 %s722_s16, 5 }
  0x10   : > { %279 = vmatpush.bf16.xpose.msra.mxu0 %v270_v3  ;;  %317 = vmatpush.bf16.xpose.msra.mxu2 %v308_v4  ;;  %v289_v7 = vsel %vm265_vm0, %v258_v6, 0  ;;  %v253_v8 = vld [vmem:[%s233_s23] sm:$0xf]  ;;  %v255_v9 = vld [vmem:[%s233_s23 + $0x8] sm:$0xf]  ;;  %s251_s7 = scalar_lea.vmem %s720_s4, %s597_s30 }
  0x11   : > { %336 = vmatpush.bf16.xpose.msra.mxu3 %v327_v5  ;;  %298 = vmatpush.bf16.xpose.msra.mxu1 %v289_v7  ;;  %v256_v10 = vld [vmem:[%s233_s23 + $0xc] sm:$0xf]  ;;  %v254_v11 = vld [vmem:[%s233_s23 + $0x4] sm:$0xf]  ;;  %v261_v53 = vld [vmem:[%s243_s29] sm:$0xf] }
  0x12   : > { %v407_v54 = vsel %vm405_vm1, %v261_v53, 0  ;;  %v263_v55 = vld [vmem:[%s243_s29 + $0x8] sm:$0xf]  ;;  %v262_v57 = vld [vmem:[%s243_s29 + $0x4] sm:$0xf] }
  0x13   : > { %v445_v56 = vsel %vm405_vm1, %v263_v55, 0  ;;  %v426_v58 = vsel %vm405_vm1, %v262_v57, 0  ;;  %v264_v59 = vld [vmem:[%s243_s29 + $0xc] sm:$0xf] }
  0x14   : > { %v464_v60 = vsel %vm405_vm1, %v264_v59, 0 }
  0x17   : > { %584 = vmatmul.msk.bf16.vlgmr.msra.gmra.mxu0 %vm265_vm0, %v253_v8  ;;  %586 = vmatmul.msk.bf16.vlgmr.msra.gmra.mxu2 %vm265_vm0, %v255_v9 }
  0x18   : > { %587 = vmatmul.msk.bf16.vlgmr.msra.gmra.mxu3 %vm265_vm0, %v256_v10  ;;  %585 = vmatmul.msk.bf16.vlgmr.msra.gmra.mxu1 %vm265_vm0, %v254_v11 }
  0x19   : > { %416 = vmatpush.bf16.msrb.mxu0 %v407_v54  ;;  %454 = vmatpush.bf16.msrb.mxu2 %v445_v56 }
  0x1a   : > { %435 = vmatpush.bf16.msrb.mxu1 %v426_v58  ;;  %473 = vmatpush.bf16.msrb.mxu3 %v464_v60 }
  0x94   : > { %v281_v13 = vpop.f32.mrf.mxu0 }
  0x95   : > { %v342_v14 = vmul.f32 0.35355338, %v281_v13  ;;  %v300_v15 = vpop.f32.mrf.mxu1 }
  0x96   : > { %v343_v17 = vmul.f32 0.35355338, %v300_v15 }
  0x97   : > { %v350_v16 = vadd.f32 %v606_v12, %v342_v14 }
  0x98   : > { %v351_v22 = vadd.f32 %v606_v12, %v343_v17 }
  0x99   : > { %v354_v18 = vsel %vm265_vm0, %v350_v16, -inf }
  0x9a   : > { %v319_v19 = vpop.f32.mrf.mxu2  ;;  %355 = vmax.xlane.f32.xlu1 %v354_v18  ;;  %v357_v28 = vsel %vm265_vm0, %v351_v22, -inf }
  0x9b   : > { %v344_v20 = vmul.f32 0.35355338, %v319_v19  ;;  %v338_v21 = vpop.f32.mrf.mxu3 }
  0x9c   : > { %v283_v23 = vpop.f32.mrf.mxu0  ;;  %v345_v24 = vmul.f32 0.35355338, %v338_v21 }
  0x9d   : > { %v352_v25 = vadd.f32 %v606_v12, %v344_v20  ;;  %v302_v26 = vpop.f32.mrf.mxu1 }
  0x9e   : > { %v353_v29 = vadd.f32 %v606_v12, %v345_v24 }
  0x9f   : > { %v360_v27 = vsel %vm265_vm0, %v352_v25, -inf }
  0xa0   : > { %361 = vmax.xlane.f32.xlu0 %v360_v27  ;;  %v363_v32 = vsel %vm265_vm0, %v353_v29, -inf }
  0xa2   : > { %v321_v30 = vpop.f32.mrf.mxu2  ;;  %358 = vmax.xlane.f32.xlu1 %v357_v28 }
  0xa3   : > { %v340_v31 = vpop.f32.mrf.mxu3 }
  0xa8   : > { %364 = vmax.xlane.f32.xlu0 %v363_v32 }
 0x10d   : > { %v356_v33 = vpop.xlane.xlu1 %355 }
 0x10e   : > { %v366_v34 = vsub.f32 %v350_v16, %v356_v33 }
 0x110   : > { %v370_v35 = vmul.f32 1.442695, %v366_v34 }
 0x112   : > { %607 = vpow2.f32 %v370_v35 }
 0x113   : > { %v362_v36 = vpop.xlane.xlu0 %361 }
 0x114   : > { %v368_v37 = vsub.f32 %v352_v25, %v362_v36 }
 0x115   : > { %v359_v38 = vpop.xlane.xlu1 %358 }
 0x116   : > { %v374_v39 = vmul.f32 1.442695, %v368_v37  ;;  %v367_v40 = vsub.f32 %v351_v22, %v359_v38 }
 0x118   : > { %v608_v41 = vpop.eup %607  ;;  %609 = vpow2.f32 %v374_v39  ;;  %v372_v42 = vmul.f32 1.442695, %v367_v40 }
 0x119   : > { %v378_v43 = vsel %vm265_vm0, %v608_v41, 0.0 }
 0x11a   : > { %611 = vpow2.f32 %v372_v42  ;;  %379 = vadd.xlane.f32.xlu0 %v378_v43 }
 0x11b   : > { %v365_v44 = vpop.xlane.xlu0 %364 }
 0x11c   : > { %v369_v45 = vsub.f32 %v353_v29, %v365_v44 }
 0x11e   : > { %v610_v46 = vpop.eup %609  ;;  %v376_v47 = vmul.f32 1.442695, %v369_v45 }
 0x11f   : > { %v384_v48 = vsel %vm265_vm0, %v610_v46, 0.0 }
 0x120   : > { %v612_v49 = vpop.eup %611  ;;  %613 = vpow2.f32 %v376_v47  ;;  %385 = vadd.xlane.f32.xlu2 %v384_v48 }
 0x121   : > { %v381_v50 = vsel %vm265_vm0, %v612_v49, 0.0 }
 0x122   : > { %382 = vadd.xlane.f32.xlu1 %v381_v50 }
 0x126   : > { %v614_v51 = vpop.eup %613 }
 0x127   : > { %v387_v52 = vsel %vm265_vm0, %v614_v51, 0.0 }
 0x128   : > { %388 = vadd.xlane.f32.xlu2 %v387_v52 }
 0x18d   : > { %v380_v61 = vpop.xlane.xlu0 %379 }
 0x18e   : > { %615 = vrcp.f32 %v380_v61 }
 0x193   : > { %v386_v62 = vpop.xlane.xlu2 %385 }
 0x194   : > { %v616_v63 = vpop.eup %615  ;;  %617 = vrcp.f32 %v386_v62 }
 0x195   : > { %v394_v0 = vmul.f32 %v616_v63, %v608_v41  ;;  %v383_v1 = vpop.xlane.xlu1 %382 }
 0x196   : > { %619 = vrcp.f32 %v383_v1 }
 0x197   : > { %v398_v2 = vpack.c.bf16 %v394_v0, %v394_v0 }
 0x199   : > { %588 = vmatmul.msk.bf16.vlgmr.msrb.gmra.mxu0 %vm265_vm0, %v398_v2 }
 0x19a   : > { %v618_v3 = vpop.eup %617 }
 0x19b   : > { %v396_v4 = vmul.f32 %v618_v3, %v610_v46  ;;  %v389_v5 = vpop.xlane.xlu2 %388 }
 0x19c   : > { %v620_v6 = vpop.eup %619  ;;  %621 = vrcp.f32 %v389_v5 }
 0x19d   : > { %v395_v7 = vmul.f32 %v620_v6, %v612_v49  ;;  %v400_v8 = vpack.c.bf16 %v396_v4, %v396_v4 }
 0x19f   : > { %v399_v9 = vpack.c.bf16 %v395_v7, %v395_v7  ;;  %590 = vmatmul.msk.bf16.vlgmr.msrb.gmra.mxu2 %vm265_vm0, %v400_v8 }
 0x1a1   : > { %589 = vmatmul.msk.bf16.vlgmr.msrb.gmra.mxu1 %vm265_vm0, %v399_v9 }
 0x1a2   : > { %v622_v10 = vpop.eup %621 }
 0x1a3   : > { %v397_v11 = vmul.f32 %v622_v10, %v614_v51 }
 0x1a5   : > { %v401_v12 = vpack.c.bf16 %v397_v11, %v397_v11 }
 0x1a7   : > { %591 = vmatmul.msk.bf16.vlgmr.msrb.gmra.mxu3 %vm265_vm0, %v401_v12 }
 0x216   : > { %v418_v13 = vpop.f32.mrf.mxu0 }
 0x217   : > { %479 = vst.msk [vmem:[%s251_s7] sm:$0xff] %vm265_vm0, %v418_v13 }
 0x21e   : > { %v420_v14 = vpop.f32.mrf.mxu0  ;;  %v437_v15 = vpop.f32.mrf.mxu1 }
 0x21f   : > { %480 = vst.msk [vmem:[%s251_s7 + $0x8] sm:$0xff] %vm265_vm0, %v437_v15 }
 0x222   : > { %v456_v16 = vpop.f32.mrf.mxu2 }
 0x223   : > { %481 = vst.msk [vmem:[%s251_s7 + $0x10] sm:$0xff] %vm265_vm0, %v456_v16 }
 0x226   : > { %v439_v17 = vpop.f32.mrf.mxu1 }
 0x22a   : > { %v458_v18 = vpop.f32.mrf.mxu2  ;;  %v475_v19 = vpop.f32.mrf.mxu3 }
 0x22b   : > { %482 = vst.msk [vmem:[%s251_s7 + $0x18] sm:$0xff] %vm265_vm0, %v475_v19 }
 0x232   : > { %v477_v20 = vpop.f32.mrf.mxu3 }
 0x233 PF: > { %s14_s15 = sadd.s32 1, %s629_s15  }
 0x234   : > { %p11_p4 = scmp.ge.s32.totalorder %s14_s15, 4  }
 0x236   :  { %13 = sbr.rel (!%p11_p4) target bundleno = 1 (0x1), region = 75 }

// kernel: transformer_forward.39
= control target key start
LH: loop header
LB: loop body
LE: loop exit
PB: predicated region body
PF: predicated region fallthrough
CT: control target
= control target key end

     0   :  { %vm48_vm0 = vcmask 261120   ;;  %vm105_vm1 = vcmask 523264   ;;  %s234_s1 = inlined_call_operand.vmem [shape: bf16[32,64], index: 1, kind: input, shape index: {}]   ;;  %s235_s2 = inlined_call_operand.vmem [shape: f32[1,64], index: 2, kind: input, shape index: {}]   ;;  %s236_s0 = inlined_call_operand.vmem [shape: bf16[16,32], index: 0, kind: input, shape index: {}]   ;;  %s237_s4 = inlined_call_operand.vmem [shape: f32[1,32], index: 4, kind: input, shape index: {}]   ;;  %s238_s3 = inlined_call_operand.vmem [shape: bf16[64,32], index: 3, kind: input, shape index: {}]   ;;  %s239_s5 = inlined_call_operand.vmem [shape: f32[16,32], index: 5, kind: output, shape index: {}]  }
   0x1   :  { %v161_v0 = vld [vmem:[%s234_s1 + $0x8] sm:$0xff]  ;;  %v160_v1 = vld [vmem:[%s234_s1] sm:$0xff]  ;;  %v165_v3 = vld [vmem:[%s238_s3 + $0x18] sm:$0xff] }
   0x2   :  { %58 = vmatpush.bf16.msra.mxu0 %v161_v0  ;;  %v159_v2 = vld [vmem:[%s236_s0] sm:$0xff]  ;;  %113 = vmatpush.bf16.msra.mxu1 %v165_v3  ;;  %v164_v4 = vld [vmem:[%s238_s3 + $0x10] sm:$0xff]  ;;  %v163_v5 = vld [vmem:[%s238_s3 + $0x8] sm:$0xff] }
   0x3   :  { %v162_v6 = vld [vmem:[%s238_s3] sm:$0xff] }
   0x4   :  { %v166_v8 = vld [vmem:[%s235_s2] ss:$0 sm:$0xff] }
   0x5   :  { %v167_v15 = vld [vmem:[%s237_s4] ss:$0 sm:$0xff] }
   0x6   :  { %59 = vmatpush.bf16.msra.mxu0 %v160_v1  ;;  %114 = vmatpush.bf16.msra.mxu1 %v164_v4 }
   0x9   :  { %141 = vmatmul.msk.bf16.vlgmr.msra.gmra.mxu0 %vm48_vm0, %v159_v2 }
   0xa   :  { %115 = vmatpush.bf16.msra.mxu1 %v163_v5 }
   0xe   :  { %116 = vmatpush.bf16.msra.mxu1 %v162_v6 }
  0x86   :  { %v61_v7 = vpop.f32.mrf.mxu0 }
  0x87   :  { %v62_v9 = vadd.f32 %v166_v8, %v61_v7 }
  0x89   :  { %v66_v12 = vmax.f32 %v62_v9, 0.0 }
  0x8e   :  { %v63_v10 = vpop.f32.mrf.mxu0 }
  0x8f   :  { %v64_v11 = vadd.f32 %v166_v8, %v63_v10 }
  0x91   :  { %v67_v13 = vmax.f32 %v64_v11, 0.0 }
  0x93   :  { %v68_v14 = vpack.c.bf16 %v67_v13, %v66_v12 }
  0x95   :  { %158 = vmatmul.msk.bf16.vlgmr.msra.gmra.mxu1 %vm105_vm1, %v68_v14 }
 0x112   :  { %v118_v16 = vpop.f32.mrf.mxu1 }
 0x113   :  { %v119_v17 = vadd.f32 %v167_v15, %v118_v16 }
 0x115   :  { %123 = vst.msk [vmem:[%s239_s5] sm:$0xff] %vm48_vm0, %v119_v17 }
 0x11a   :  { %v120_v18 = vpop.f32.mrf.mxu1 }
 0x11b   :  { %v121_v19 = vadd.f32 %v167_v15, %v120_v18 }
 0x11d   :  { %124 = vst.msk [vmem:[%s239_s5 + $0x8] sm:$0xff] %vm48_vm0, %v121_v19 }

</bundles_post_ra>
